<compile_context>
chip_gen: v7x
topology: tpu7x:2x2x1
jax: 0.10.0
libtpu: 0.0.40
codegen_flags: <defaults>
</compile_context>

<pallas_src>
import math

import jax
import jax.numpy as jnp
from jax.experimental import pallas as pl
from jax.experimental.pallas import tpu as pltpu

NEG_SLOPE = 0.01      # F.leaky_relu default negative_slope
MASK_VAL = -1e30      # only used by the plain-JAX reference

# Single-copy bf16-z budget under which z is held fully VMEM-resident in the
# attention kernel (leaves room for double-buffered adj/out tiles on every
# generation, including v7x's 64 MiB physical VMEM).
_Z_RESIDENT_BUDGET = 12 * 1024 * 1024


def _round_up(x, m):
    return (x + m - 1) // m * m


# ---------------------------------------------------------------------------
# Prologue: z = h @ wf + bf ;  s_src = z . a_src ;  s_dst = z . a_dst
# ---------------------------------------------------------------------------
def _fc_kernel(h_ref, wf_ref, bf_ref, asrc_ref, adst_ref,
               z_ref, ssrc_ref, sdst_ref):
    z = jnp.dot(h_ref[...], wf_ref[...],
                preferred_element_type=jnp.float32) + bf_ref[...]
    z_ref[...] = z.astype(z_ref.dtype)            # bf16 copy for the MXU path
    # tiny per-node scores on the VPU/XLU (avoids 1-lane-wide MXU matmuls)
    ssrc_ref[...] = jnp.sum(z * asrc_ref[...], axis=-1, keepdims=True)
    sdst_ref[...] = jnp.sum(z * adst_ref[...], axis=-1, keepdims=True)


# ---------------------------------------------------------------------------
# Main: tiled masked softmax + aggregation (bound-based softmax, no rescale)
# ---------------------------------------------------------------------------
def _make_attn_kernel(z_resident):
    def kernel(sdst_ref, ssrc_ref, mrow_ref, adj_ref, z_ref, out_ref, l_ref):
        j = pl.program_id(1)

        @pl.when(j == 0)
        def _init():
            l_ref[...] = jnp.zeros_like(l_ref)
            out_ref[...] = jnp.zeros_like(out_ref)

        # e[i, j] = leaky_relu(s_dst[i] + b + s_src[j]) for this (TI, TJ) tile
        e = sdst_ref[...] + ssrc_ref[...]          # (TI,1)+(1,TJ) -> (TI,TJ)
        e = jnp.where(e > 0, e, NEG_SLOPE * e)
        # e <= m_row by construction (m_row uses the global max of s_src and
        # leaky_relu is monotone), so exp never overflows.  Non-edges are
        # zeroed multiplicatively by the int8 0/1 mask.  exp stays f32 (v5e
        # has no bf16 EUP).
        p = jnp.exp(e - mrow_ref[...])
        p = p * adj_ref[...].astype(jnp.float32)

        l_ref[...] += jnp.sum(p, axis=-1, keepdims=True)

        z_blk = z_ref[j] if z_resident else z_ref[...]       # (TJ, D) bf16
        out_ref[...] += jnp.dot(p.astype(jnp.bfloat16), z_blk,
                                preferred_element_type=jnp.float32)

        @pl.when(j == pl.num_programs(1) - 1)
        def _finalize():
            inv_l = pl.reciprocal(l_ref[...], approx=True)   # once per row tile
            out_ref[...] = (out_ref[...] * inv_l).astype(out_ref.dtype)

    return kernel


# ---------------------------------------------------------------------------
# Wrapper
# ---------------------------------------------------------------------------
def gat_forward(h, adj, wf, bf, a_src, a_dst, b_attn, *,
                tile_dst=512, tile_src=512):
    """GAT layer forward.  adj[dst, src] = 1.0 iff there is an edge src->dst.

    Every destination must have at least one in-edge (e.g. self loops) —
    same precondition as the DGL softmax reduce.  Tile sizes must be
    multiples of 128 (they are clamped to the padded node count).
    """
    N, in_dim = h.shape
    out_dim = wf.shape[1]
    assert tile_dst % 128 == 0 and tile_src % 128 == 0

    f32 = jnp.float32
    bf16 = jnp.bfloat16

    N128 = _round_up(N, 128)
    TI = min(tile_dst, N128)
    TJ = min(tile_src, N128)
    N_pad = _round_up(N, math.lcm(TI, TJ))
    D = _round_up(out_dim, 128)             # lane-dense feature dim

    # --- pad parameters along the feature dim (zero padding is exact) -------
    wf_p = jnp.pad(wf.astype(f32), ((0, 0), (0, D - out_dim)))
    bf_p = jnp.pad(bf.astype(f32).reshape(1, out_dim), ((0, 0), (0, D - out_dim)))
    asrc_p = jnp.pad(a_src.astype(f32).reshape(1, out_dim), ((0, 0), (0, D - out_dim)))
    adst_p = jnp.pad(a_dst.astype(f32).reshape(1, out_dim), ((0, 0), (0, D - out_dim)))

    # --- pad the node dim ----------------------------------------------------
    h_p = jnp.pad(h.astype(f32), ((0, N_pad - N), (0, 0)))

    # 0/1 edge mask as int8 (the irreducible O(N^2) HBM stream).  Padded dst
    # rows get a self loop so their (discarded) rows never hit 0/0.
    adj_i8 = jnp.pad((adj > 0).astype(jnp.int8),
                     ((0, N_pad - N), (0, N_pad - N)))
    pad_diag = jnp.diag((jnp.arange(N_pad) >= N).astype(jnp.int8))
    adj_i8 = jnp.maximum(adj_i8, pad_diag)

    # --- prologue: z (bf16), s_src, s_dst — computed once --------------------
    n_row_tiles = N_pad // TI
    z, s_src, s_dst = pl.pallas_call(
        _fc_kernel,
        out_shape=(jax.ShapeDtypeStruct((N_pad, D), bf16),
                   jax.ShapeDtypeStruct((N_pad, 1), f32),
                   jax.ShapeDtypeStruct((N_pad, 1), f32)),
        grid=(n_row_tiles,),
        in_specs=[pl.BlockSpec((TI, in_dim), lambda i: (i, 0)),
                  pl.BlockSpec((in_dim, D), lambda i: (0, 0)),
                  pl.BlockSpec((1, D), lambda i: (0, 0)),
                  pl.BlockSpec((1, D), lambda i: (0, 0)),
                  pl.BlockSpec((1, D), lambda i: (0, 0))],
        out_specs=(pl.BlockSpec((TI, D), lambda i: (i, 0)),
                   pl.BlockSpec((TI, 1), lambda i: (i, 0)),
                   pl.BlockSpec((TI, 1), lambda i: (i, 0))),
        compiler_params=pltpu.CompilerParams(
            dimension_semantics=("parallel",)),
    )(h_p, wf_p, bf_p, asrc_p, adst_p)

    # Layout plumbing outside the hot loop: s_src as a lane-major (1, N) row,
    # attention bias b folded into s_dst, and the per-row softmax max replaced
    # by the constant-per-row upper bound leaky_relu(s_dst + b + max_j s_src).
    # (Bound-based softmax only underflows if every edge of a row scores >~87
    # below the bound — unreachable for realistic GAT score magnitudes.)
    s_src_row = s_src.reshape(1, N_pad)
    s_dst_col = s_dst + b_attn.reshape(1, 1).astype(f32)
    e_bound = s_dst_col + jnp.max(s_src)
    m_row = jnp.where(e_bound > 0, e_bound, NEG_SLOPE * e_bound)

    # --- main tiled attention kernel -----------------------------------------
    z_bytes = N_pad * D * 2
    z_resident = z_bytes <= _Z_RESIDENT_BUDGET
    if z_resident:
        nb = N_pad // TJ
        z_in = z.reshape(nb, TJ, D)
        z_spec = pl.BlockSpec((nb, TJ, D), lambda i, j: (0, 0, 0))  # fetched once
        z_vmem = 2 * z_bytes
    else:
        z_in = z
        z_spec = pl.BlockSpec((TJ, D), lambda i, j: (j, 0))         # streamed
        z_vmem = 2 * TJ * D * 2

    # Derive the scoped-VMEM request from the actual footprint (double-buffered
    # int8 adj + resident f32 out block + z) and cap it below v7x's 64 MiB.
    vmem_needed = 2 * TI * TJ + 2 * TI * D * 4 + z_vmem + (1 << 20)
    vmem_limit = int(min(max(2 * vmem_needed, 16 << 20), 56 << 20))

    grid = (N_pad // TI, N_pad // TJ)
    out_p = pl.pallas_call(
        _make_attn_kernel(z_resident),
        out_shape=jax.ShapeDtypeStruct((N_pad, D), f32),
        grid=grid,
        in_specs=[pl.BlockSpec((TI, 1), lambda i, j: (i, 0)),    # s_dst (+b)
                  pl.BlockSpec((1, TJ), lambda i, j: (0, j)),    # s_src row
                  pl.BlockSpec((TI, 1), lambda i, j: (i, 0)),    # row max bound
                  pl.BlockSpec((TI, TJ), lambda i, j: (i, j)),   # int8 adjacency
                  z_spec],                                       # z (sources)
        out_specs=pl.BlockSpec((TI, D), lambda i, j: (i, 0)),
        scratch_shapes=[pltpu.VMEM((TI, 1), f32)],               # running denom
        compiler_params=pltpu.CompilerParams(
            dimension_semantics=("parallel", "arbitrary"),
            vmem_limit_bytes=vmem_limit),
    )(s_dst_col, s_src_row, m_row, adj_i8, z_in)

    return out_p[:N, :out_dim]


# ---------------------------------------------------------------------------
# Plain-JAX reference (identical semantics, f32) for verification
# ---------------------------------------------------------------------------
def gat_reference(h, adj, wf, bf, a_src, a_dst, b_attn):
    z = h @ wf + bf
    s_src = z @ a_src
    s_dst = z @ a_dst
    e = s_dst + s_src.T + b_attn
    e = jnp.where(e > 0, e, NEG_SLOPE * e)
    mask = adj > 0.0
    e = jnp.where(mask, e, MASK_VAL)
    m = jnp.max(e, axis=-1, keepdims=True)
    p = jnp.where(mask, jnp.exp(e - m), 0.0)
    alpha = p / jnp.sum(p, axis=-1, keepdims=True)
    return alpha @ z


if __name__ == "__main__":
    jax.config.update("jax_default_matmul_precision", "highest")

    N, in_dim, out_dim = 256, 32, 16
    key = jax.random.PRNGKey(0)
    k_h, k_wf, k_bf, k_wa, k_ba, k_adj = jax.random.split(key, 6)

    # node features
    h = jax.random.normal(k_h, (N, in_dim), dtype=jnp.float32)

    # fc: Linear(in_dim, out_dim), xavier_normal_(gain=sqrt(2)) on weight
    gain = jnp.sqrt(2.0)
    std_fc = gain * jnp.sqrt(2.0 / (in_dim + out_dim))
    wf = std_fc * jax.random.normal(k_wf, (in_dim, out_dim), jnp.float32)   # fc.weight.T
    bound_fc = 1.0 / jnp.sqrt(in_dim)
    bf = jax.random.uniform(k_bf, (1, out_dim), jnp.float32, -bound_fc, bound_fc)

    # attn_fc: Linear(2*out_dim, 1), xavier_normal_(gain=sqrt(2)) on weight
    std_a = gain * jnp.sqrt(2.0 / (2 * out_dim + 1))
    attn_w = std_a * jax.random.normal(k_wa, (1, 2 * out_dim), jnp.float32)
    a_src = attn_w[0, :out_dim].reshape(out_dim, 1)    # applied to edges.src['z']
    a_dst = attn_w[0, out_dim:].reshape(out_dim, 1)    # applied to edges.dst['z']
    bound_a = 1.0 / jnp.sqrt(2 * out_dim)
    b_attn = jax.random.uniform(k_ba, (1, 1), jnp.float32, -bound_a, bound_a)

    # synthetic graph: random edges + guaranteed self-loops (every node has an
    # in-edge, matching a well-formed DGL graph for update_all).
    adj = jax.random.bernoulli(k_adj, 0.1, (N, N)).astype(jnp.float32)
    adj = jnp.maximum(adj, jnp.eye(N, dtype=jnp.float32))    # adj[dst, src]

    out = gat_forward(h, adj, wf, bf, a_src, a_dst, b_attn,
                      tile_dst=512, tile_src=512)
    out = jax.block_until_ready(out)

    ref = gat_reference(h, adj, wf, bf, a_src, a_dst, b_attn)
    assert out.shape == (N, out_dim)
    # bf16 z / bf16 p on the MXU + approx reciprocal => compare at ~1e-2 level
    assert jnp.allclose(out, ref, rtol=2e-2, atol=2e-2), "mismatch vs. reference"

    print("KERNEL_OK")
</pallas_src>

<mosaic_0001>
module attributes {stable_mosaic.version = 11 : i64} {
  func.func @_fc_kernel(%arg0: i32, %arg1: memref<256x32xf32, #tpu.memory_space<vmem>>, %arg2: memref<32x128xf32, #tpu.memory_space<vmem>>, %arg3: memref<1x128xf32, #tpu.memory_space<vmem>>, %arg4: memref<1x128xf32, #tpu.memory_space<vmem>>, %arg5: memref<1x128xf32, #tpu.memory_space<vmem>>, %arg6: memref<256x128xbf16, #tpu.memory_space<vmem>>, %arg7: memref<256x1xf32, #tpu.memory_space<vmem>>, %arg8: memref<256x1xf32, #tpu.memory_space<vmem>>) attributes {dimension_semantics = [#tpu.dimension_semantics<parallel>], iteration_bounds = array<i64: 1>, scalar_prefetch = 0 : i64, scratch_operands = 0 : i64, tpu.core_type = #tpu.core_type<tc>, window_params = [{transform_indices = @transform_0, window_bounds = array<i64: 256, 32>}, {pipeline_mode = #tpu.pipeline_mode<synchronous>, transform_indices = @transform_1, window_bounds = array<i64: 32, 128>}, {pipeline_mode = #tpu.pipeline_mode<synchronous>, transform_indices = @transform_2, window_bounds = array<i64: 1, 128>}, {pipeline_mode = #tpu.pipeline_mode<synchronous>, transform_indices = @transform_3, window_bounds = array<i64: 1, 128>}, {pipeline_mode = #tpu.pipeline_mode<synchronous>, transform_indices = @transform_4, window_bounds = array<i64: 1, 128>}, {transform_indices = @transform_5, window_bounds = array<i64: 256, 128>}, {transform_indices = @transform_6, window_bounds = array<i64: 256, 1>}, {transform_indices = @transform_7, window_bounds = array<i64: 256, 1>}]} {
    %c0 = arith.constant 0 : index
    %c0_0 = arith.constant 0 : index
    %0 = vector.load %arg1[%c0, %c0_0] : memref<256x32xf32, #tpu.memory_space<vmem>>, vector<256x32xf32>
    %c0_1 = arith.constant 0 : index
    %c0_2 = arith.constant 0 : index
    %1 = vector.load %arg2[%c0_1, %c0_2] : memref<32x128xf32, #tpu.memory_space<vmem>>, vector<32x128xf32>
    %cst = arith.constant dense<0.000000e+00> : vector<256x128xf32>
    %2 = tpu.matmul %0, %1, %cst {dimension_numbers = #tpu.dot_dimension_numbers<[1], [0], [0], [1], [0, 0, 1, 1], [], []>, precision = #tpu.contract_precision<fp32>} : vector<256x32xf32>, vector<32x128xf32>, vector<256x128xf32> -> vector<256x128xf32>
    %c0_3 = arith.constant 0 : index
    %c0_4 = arith.constant 0 : index
    %3 = vector.load %arg3[%c0_3, %c0_4] : memref<1x128xf32, #tpu.memory_space<vmem>>, vector<1x128xf32>
    %4 = vector.broadcast %3 : vector<1x128xf32> to vector<256x128xf32>
    %5 = arith.addf %2, %4 : vector<256x128xf32>
    %6 = arith.truncf %5 : vector<256x128xf32> to vector<256x128xbf16>
    %c0_5 = arith.constant 0 : index
    %c0_6 = arith.constant 0 : index
    %7 = vector.load %arg6[%c0_5, %c0_6] : memref<256x128xbf16, #tpu.memory_space<vmem>>, vector<256x128xbf16>
    tpu.vector_store %arg6[%c0_5, %c0_6], %6 {strides = array<i32>} : memref<256x128xbf16, #tpu.memory_space<vmem>>, vector<256x128xbf16>,
    %c0_7 = arith.constant 0 : index
    %c0_8 = arith.constant 0 : index
    %8 = vector.load %arg4[%c0_7, %c0_8] : memref<1x128xf32, #tpu.memory_space<vmem>>, vector<1x128xf32>
    %9 = vector.broadcast %8 : vector<1x128xf32> to vector<256x128xf32>
    %10 = arith.mulf %5, %9 : vector<256x128xf32>
    %cst_9 = arith.constant dense<0.000000e+00> : vector<256xf32>
    %11 = vector.multi_reduction <add>, %10, %cst_9 [1] : vector<256x128xf32> to vector<256xf32>
    %12 = vector.shape_cast %11 : vector<256xf32> to vector<256x1xf32>
    %c0_10 = arith.constant 0 : index
    %c0_11 = arith.constant 0 : index
    %13 = vector.load %arg7[%c0_10, %c0_11] : memref<256x1xf32, #tpu.memory_space<vmem>>, vector<256x1xf32>
    tpu.vector_store %arg7[%c0_10, %c0_11], %12 {strides = array<i32>} : memref<256x1xf32, #tpu.memory_space<vmem>>, vector<256x1xf32>,
    %c0_12 = arith.constant 0 : index
    %c0_13 = arith.constant 0 : index
    %14 = vector.load %arg5[%c0_12, %c0_13] : memref<1x128xf32, #tpu.memory_space<vmem>>, vector<1x128xf32>
    %15 = vector.broadcast %14 : vector<1x128xf32> to vector<256x128xf32>
    %16 = arith.mulf %5, %15 : vector<256x128xf32>
    %cst_14 = arith.constant dense<0.000000e+00> : vector<256xf32>
    %17 = vector.multi_reduction <add>, %16, %cst_14 [1] : vector<256x128xf32> to vector<256xf32>
    %18 = vector.shape_cast %17 : vector<256xf32> to vector<256x1xf32>
    %c0_15 = arith.constant 0 : index
    %c0_16 = arith.constant 0 : index
    %19 = vector.load %arg8[%c0_15, %c0_16] : memref<256x1xf32, #tpu.memory_space<vmem>>, vector<256x1xf32>
    tpu.vector_store %arg8[%c0_15, %c0_16], %18 {strides = array<i32>} : memref<256x1xf32, #tpu.memory_space<vmem>>, vector<256x1xf32>,
    return
  }
  func.func @transform_0(%arg0: i32) -> (i32, i32) {
    %c0_i32 = arith.constant 0 : i32
    %c0_i32_0 = arith.constant 0 : i32
    return %arg0, %c0_i32 : i32, i32
  }
  func.func @transform_1(%arg0: i32) -> (i32, i32) {
    %c0_i32 = arith.constant 0 : i32
    %c0_i32_0 = arith.constant 0 : i32
    %c0_i32_1 = arith.constant 0 : i32
    return %c0_i32, %c0_i32_0 : i32, i32
  }
  func.func @transform_2(%arg0: i32) -> (i32, i32) {
    %c0_i32 = arith.constant 0 : i32
    %c0_i32_0 = arith.constant 0 : i32
    %c0_i32_1 = arith.constant 0 : i32
    return %c0_i32, %c0_i32_0 : i32, i32
  }
  func.func @transform_3(%arg0: i32) -> (i32, i32) {
    %c0_i32 = arith.constant 0 : i32
    %c0_i32_0 = arith.constant 0 : i32
    %c0_i32_1 = arith.constant 0 : i32
    return %c0_i32, %c0_i32_0 : i32, i32
  }
  func.func @transform_4(%arg0: i32) -> (i32, i32) {
    %c0_i32 = arith.constant 0 : i32
    %c0_i32_0 = arith.constant 0 : i32
    %c0_i32_1 = arith.constant 0 : i32
    return %c0_i32, %c0_i32_0 : i32, i32
  }
  func.func @transform_5(%arg0: i32) -> (i32, i32) {
    %c0_i32 = arith.constant 0 : i32
    %c0_i32_0 = arith.constant 0 : i32
    return %arg0, %c0_i32 : i32, i32
  }
  func.func @transform_6(%arg0: i32) -> (i32, i32) {
    %c0_i32 = arith.constant 0 : i32
    %c0_i32_0 = arith.constant 0 : i32
    return %arg0, %c0_i32 : i32, i32
  }
  func.func @transform_7(%arg0: i32) -> (i32, i32) {
    %c0_i32 = arith.constant 0 : i32
    %c0_i32_0 = arith.constant 0 : i32
    return %arg0, %c0_i32 : i32, i32
  }
}

</mosaic_0001>

<bundles_post_ra>
// kernel: tpu_custom_call.1
= control target key start
LH: loop header
LB: loop body
LE: loop exit
PB: predicated region body
PF: predicated region fallthrough
CT: control target
= control target key end

     0   :  { %vm67_vm0 = vcmask 261120   ;;  %s4501_s0 = inlined_call_operand.vmem [shape: f32[256,32], index: 0, kind: input, shape index: {}]   ;;  %s4502_s1 = inlined_call_operand.vmem [shape: f32[32,128], index: 1, kind: input, shape index: {}]   ;;  %s4503_s2 = inlined_call_operand.vmem [shape: f32[1,128], index: 2, kind: input, shape index: {}]   ;;  %s4504_s3 = inlined_call_operand.vmem [shape: f32[1,128], index: 3, kind: input, shape index: {}]   ;;  %s4505_s4 = inlined_call_operand.vmem [shape: f32[1,128], index: 4, kind: input, shape index: {}]   ;;  %s4506_s5 = inlined_call_operand.hbm [shape: bf16[256,128], index: 5, kind: output, shape index: {0}]   ;;  %s4507_s6 = inlined_call_operand.vmem [shape: f32[256,1], index: 6, kind: output, shape index: {1}]   ;;  %s4508_s7 = inlined_call_operand.vmem [shape: f32[256,1], index: 7, kind: output, shape index: {2}]  }
   0x1   :  { %v56_v0 = vld [vmem:[%s4502_s1] sm:$0xff]  ;;  %v57_v1 = vld [vmem:[%s4502_s1 + $0x8] sm:$0xff]  ;;  %v3470_v2 = vld [vmem:[%s4502_s1 + $0x10] sm:$0xff] }
   0x2   :  { %v165_v3 = vand.u32 4294901760, %v56_v0  ;;  %v168_v4 = vand.u32 4294901760, %v57_v1  ;;  %v3475_v5 = vld [vmem:[%s4502_s1 + $0x18] sm:$0xff]  ;;  %v171_v6 = vand.u32 4294901760, %v3470_v2  ;;  %v24_v7 = vld [vmem:[%s4501_s0] sm:$0xff]  ;;  %v25_v8 = vld [vmem:[%s4501_s0 + $0x8] sm:$0xff] }
   0x3   :  { %v174_v9 = vand.u32 4294901760, %v3475_v5  ;;  %v69_v10 = vsel %vm67_vm0, %v24_v7, 0  ;;  %v72_v11 = vsel %vm67_vm0, %v25_v8, 0  ;;  %v26_v12 = vld [vmem:[%s4501_s0 + $0x10] sm:$0xff]  ;;  %v27_v13 = vld [vmem:[%s4501_s0 + $0x18] sm:$0xff]  ;;  %v28_v18 = vld [vmem:[%s4501_s0 + $0x20] sm:$0xff] }
   0x4   :  { %v3493_v14 = vpack.c.bf16 %v168_v4, %v165_v3  ;;  %v3495_v15 = vand.u32 4294901760, %v69_v10  ;;  %v3497_v16 = vand.u32 4294901760, %v72_v11  ;;  %v3499_v17 = vsub.f32 %v56_v0, %v165_v3  ;;  %v29_v19 = vld [vmem:[%s4501_s0 + $0x28] sm:$0xff]  ;;  %v30_v40 = vld [vmem:[%s4501_s0 + $0x30] sm:$0xff]  ;;  %v31_v49 = vld [vmem:[%s4501_s0 + $0x38] sm:$0xff] }
   0x5   :  { %v3511_v20 = vpack.c.bf16 %v174_v9, %v171_v6  ;;  %v3513_v21 = vsub.f32 %v57_v1, %v168_v4  ;;  %v75_v22 = vsel %vm67_vm0, %v26_v12, 0  ;;  %v78_v23 = vsel %vm67_vm0, %v27_v13, 0  ;;  %v32_v50 = vld [vmem:[%s4501_s0 + $0x40] sm:$0xff]  ;;  %v33_v59 = vld [vmem:[%s4501_s0 + $0x48] sm:$0xff]  ;;  %v34_v60 = vld [vmem:[%s4501_s0 + $0x50] sm:$0xff] }
   0x6   :  { %3152 = vmatprep.subr.bf16.mxu1 %v3493_v14  ;;  %3176 = vmatprep.subr.bf16.mxu0 %v3493_v14  ;;  %v3520_v24 = vsub.f32 %v69_v10, %v3495_v15  ;;  %v3523_v25 = vsub.f32 %v72_v11, %v3497_v16  ;;  %v556_v26 = vand.u32 4294901760, %v3499_v17  ;;  %v3526_v27 = vand.u32 4294901760, %v75_v22 }
   0x7   :  { %3154 = vmatpush3.bf16.msra.mxu1 %v3493_v14  ;;  %3178 = vmatpush3.bf16.msra.mxu0 %v3493_v14  ;;  %v563_v28 = vand.u32 4294901760, %v3513_v21  ;;  %v3531_v29 = vand.u32 4294901760, %v78_v23  ;;  %v81_v30 = vsel %vm67_vm0, %v28_v18, 0  ;;  %v84_v31 = vsel %vm67_vm0, %v29_v19, 0 }
   0x8   :  { %3156 = vmatprep.subr.bf16.mxu1 %v3511_v20  ;;  %3180 = vmatprep.subr.bf16.mxu0 %v3511_v20  ;;  %v235_v32 = vand.u32 4294901760, %v3520_v24  ;;  %v245_v33 = vand.u32 4294901760, %v3523_v25  ;;  %v557_v34 = vsub.f32 %v3499_v17, %v556_v26  ;;  %v3541_v35 = vsub.f32 %v75_v22, %v3526_v27 }
   0x9   :  { %v564_v36 = vsub.f32 %v3513_v21, %v563_v28  ;;  %v3183_v37 = vpack.c.bf16 %v563_v28, %v556_v26  ;;  %v3545_v38 = vsub.f32 %v78_v23, %v3531_v29  ;;  %v3547_v39 = vand.u32 4294901760, %v81_v30 }
   0xa   :  { %4534 = vst [vmem:[#allocation5_spill] sm:$0xff] %v3541_v35  ;;  %v236_v41 = vsub.f32 %v3520_v24, %v235_v32  ;;  %2991 = vmatprep.mubr.f32.mxu0 %v235_v32  ;;  %v246_v42 = vsub.f32 %v3523_v25, %v245_v33  ;;  %v558_v43 = vand.u32 4294901760, %v557_v34  ;;  %v255_v44 = vand.u32 4294901760, %v3541_v35 }
   0xb   :  { %4535 = vst [vmem:[#allocation6_spill] sm:$0xff] %v3545_v38  ;;  %3158 = vmatpush3.bf16.msra.mxu1 %v3511_v20  ;;  %3182 = vmatpush3.bf16.msra.mxu0 %v3511_v20  ;;  %v565_v45 = vand.u32 4294901760, %v564_v36  ;;  %v265_v46 = vand.u32 4294901760, %v3545_v38  ;;  %v3559_v47 = vsub.f32 %v81_v30, %v3547_v39  ;;  %v3561_v48 = vand.u32 4294901760, %v84_v31 }
   0xc   :  { %v237_v51 = vand.u32 4294901760, %v236_v41  ;;  %v247_v52 = vand.u32 4294901760, %v246_v42  ;;  %3184 = vmatprep.subr.bf16.mxu0 %v3183_v37  ;;  %v256_v53 = vsub.f32 %v3541_v35, %v255_v44  ;;  %v87_v54 = vsel %vm67_vm0, %v30_v40, 0 }
   0xd   :  { %4536 = vst [vmem:[#allocation7_spill] sm:$0xff] %v3559_v47  ;;  %v3159_v55 = vpack.c.bf16 %v565_v45, %v558_v43  ;;  %v266_v56 = vsub.f32 %v3545_v38, %v265_v46  ;;  %v275_v57 = vand.u32 4294901760, %v3559_v47  ;;  %v3574_v58 = vsub.f32 %v84_v31, %v3561_v48 }
   0xf   :  { %4537 = vst [vmem:[#allocation8_spill] sm:$0xff] %v3574_v58 }
  0x10   :  { %13 = vsyncpa [#allocation3], 0  ;;  %2823 = vmatprep.mubr.f32.mxu1 %v237_v51  ;;  %2992 = vmatmul.mubr.f32.vlgmr.msra.gmra.mrb[0].mxu0 %v245_v33  ;;  %v257_v61 = vand.u32 4294901760, %v256_v53  ;;  %v3582_v62 = vand.u32 4294901760, %v87_v54  ;;  %v90_v63 = vsel %vm67_vm0, %v31_v49, 0  ;;  %v93_v0 = vsel %vm67_vm0, %v32_v50, 0 }
  0x11   :  { %2824 = vmatmul.mubr.f32.vlgmr.msra.gmra.mrb[0].mxu1 %v247_v52  ;;  %3160 = vmatprep.subr.bf16.mxu1 %v3159_v55  ;;  %v267_v1 = vand.u32 4294901760, %v266_v56  ;;  %v276_v3 = vsub.f32 %v3559_v47, %v275_v57  ;;  %v285_v4 = vand.u32 4294901760, %v3574_v58  ;;  %v3588_v7 = vand.u32 4294901760, %v90_v63  ;;  %v35_v8 = vld [vmem:[%s4501_s0 + $0x58] sm:$0xff]  ;;  %v36_v26 = vld [vmem:[%s4501_s0 + $0x60] sm:$0xff]  ;;  %v37_v40 = vld [vmem:[%s4501_s0 + $0x68] sm:$0xff] }
  0x12   :  { %3162 = vmatpush3.bf16.msra.mxu1 %v3159_v55  ;;  %2826 = vmatprep.mubr.f32.mxu1 %v257_v61  ;;  %v3594_v10 = vsub.f32 %v87_v54, %v3582_v62  ;;  %v3596_v11 = vand.u32 4294901760, %v93_v0  ;;  %v96_v12 = vsel %vm67_vm0, %v33_v59, 0  ;;  %v99_v13 = vsel %vm67_vm0, %v34_v60, 0  ;;  %v38_v51 = vld [vmem:[%s4501_s0 + $0x70] sm:$0xff]  ;;  %v39_v61 = vld [vmem:[%s4501_s0 + $0x78] sm:$0xff] }
  0x13   :  { %2994 = vmatprep.mubr.f32.mxu0 %v255_v44  ;;  %3186 = vmatpush3.bf16.msra.mxu0 %v3183_v37  ;;  %v277_v18 = vand.u32 4294901760, %v276_v3  ;;  %v286_v19 = vsub.f32 %v3574_v58, %v285_v4  ;;  %v3602_v22 = vsub.f32 %v90_v63, %v3588_v7  ;;  %v3604_v23 = vand.u32 4294901760, %v96_v12  ;;  %v40_v63 = vld [vmem:[%s4501_s0 + $0x80] sm:$0xff] }
  0x14   :  { %4538 = vst [vmem:[#allocation9_spill] sm:$0xff] %v3594_v10  ;;  %2995 = vmatmul.mubr.f32.gmra.mrb[2].mxu0 %v265_v46  ;;  %v295_v28 = vand.u32 4294901760, %v3594_v10  ;;  %v3611_v30 = vsub.f32 %v93_v0, %v3596_v11  ;;  %v3613_v31 = vand.u32 4294901760, %v99_v13  ;;  %v102_v32 = vsel %vm67_vm0, %v35_v8, 0 }
  0x15   :  { %4539 = vst [vmem:[#allocation10_spill] sm:$0xff] %v3602_v22  ;;  %2827 = vmatmul.mubr.f32.gmra.mrb[2].mxu1 %v267_v1  ;;  %2997 = vmatprep.mubr.f32.mxu0 %v275_v57  ;;  %v287_v33 = vand.u32 4294901760, %v286_v19  ;;  %v305_v34 = vand.u32 4294901760, %v3602_v22  ;;  %v3618_v36 = vsub.f32 %v96_v12, %v3604_v23  ;;  %v3620_v37 = vand.u32 4294901760, %v102_v32 }
  0x16   :  { %4540 = vst [vmem:[#allocation11_spill] sm:$0xff] %v3611_v30  ;;  %2829 = vmatprep.mubr.f32.mxu1 %v277_v18  ;;  %v296_v41 = vsub.f32 %v3594_v10, %v295_v28  ;;  %v315_v42 = vand.u32 4294901760, %v3611_v30  ;;  %v3628_v43 = vsub.f32 %v99_v13, %v3613_v31  ;;  %v105_v44 = vsel %vm67_vm0, %v36_v26, 0  ;;  %v41_v18 = vld [vmem:[%s4501_s0 + $0x88] sm:$0xff] }
  0x17   :  { %4541 = vst [vmem:[#allocation12_spill] sm:$0xff] %v3618_v36  ;;  %v306_v45 = vsub.f32 %v3602_v22, %v305_v34  ;;  %v325_v46 = vand.u32 4294901760, %v3618_v36  ;;  %v3634_v49 = vsub.f32 %v102_v32, %v3620_v37  ;;  %v3636_v50 = vand.u32 4294901760, %v105_v44 }
  0x18   :  { %4542 = vst [vmem:[#allocation13_spill] sm:$0xff] %v3628_v43  ;;  %2998 = vmatmul.mubr.f32.gmra.mrb[4].mxu0 %v285_v4  ;;  %v297_v52 = vand.u32 4294901760, %v296_v41  ;;  %v316_v53 = vsub.f32 %v3611_v30, %v315_v42  ;;  %v335_v54 = vand.u32 4294901760, %v3628_v43  ;;  %v108_v55 = vsel %vm67_vm0, %v37_v40, 0 }
  0x19   :  { %4543 = vst [vmem:[#allocation14_spill] sm:$0xff] %v3634_v49  ;;  %2830 = vmatmul.mubr.f32.gmra.mrb[4].mxu1 %v287_v33  ;;  %3000 = vmatprep.mubr.f32.mxu0 %v295_v28  ;;  %v307_v56 = vand.u32 4294901760, %v306_v45  ;;  %v326_v57 = vsub.f32 %v3618_v36, %v325_v46  ;;  %v345_v59 = vand.u32 4294901760, %v3634_v49  ;;  %v3647_v60 = vsub.f32 %v105_v44, %v3636_v50 }
  0x1a   :  { %2832 = vmatprep.mubr.f32.mxu1 %v297_v52  ;;  %v317_v0 = vand.u32 4294901760, %v316_v53  ;;  %v336_v1 = vsub.f32 %v3628_v43, %v335_v54  ;;  %v3656_v3 = vand.u32 4294901760, %v108_v55  ;;  %v111_v4 = vsel %vm67_vm0, %v38_v51, 0 }
  0x1b   :  { %4544 = vst [vmem:[#allocation15_spill] sm:$0xff] %v3647_v60  ;;  %v346_v8 = vsub.f32 %v3634_v49, %v345_v59  ;;  %v355_v12 = vand.u32 4294901760, %v3647_v60  ;;  %v3661_v13 = vand.u32 4294901760, %v111_v4  ;;  %v327_v19 = vand.u32 4294901760, %v326_v57 }
  0x1c   :  { %3001 = vmatmul.mubr.f32.gmra.mrb[6].mxu0 %v305_v34  ;;  %v3667_v26 = vsub.f32 %v108_v55, %v3656_v3  ;;  %v114_v28 = vsel %vm67_vm0, %v39_v61, 0  ;;  %v117_v32 = vsel %vm67_vm0, %v40_v63, 0  ;;  %v337_v33 = vand.u32 4294901760, %v336_v1 }
  0x1d   :  { %2833 = vmatmul.mubr.f32.gmra.mrb[6].mxu1 %v307_v56  ;;  %3003 = vmatprep.mubr.f32.mxu0 %v315_v42  ;;  %v356_v40 = vsub.f32 %v3647_v60, %v355_v12  ;;  %v3673_v41 = vsub.f32 %v111_v4, %v3661_v13  ;;  %v3675_v44 = vand.u32 4294901760, %v114_v28  ;;  %v3678_v45 = vand.u32 4294901760, %v117_v32  ;;  %v42_v42 = vld [vmem:[%s4501_s0 + $0x90] sm:$0xff] }
  0x1e   :  { %4545 = vst [vmem:[#allocation16_spill] sm:$0xff] %v3667_v26  ;;  %2835 = vmatprep.mubr.f32.mxu1 %v317_v0  ;;  %v365_v34 = vand.u32 4294901760, %v3667_v26  ;;  %v120_v51 = vsel %vm67_vm0, %v41_v18, 0  ;;  %v3684_v52 = vsub.f32 %v3470_v2, %v171_v6  ;;  %v347_v53 = vand.u32 4294901760, %v346_v8 }
  0x1f   :  { %4546 = vst [vmem:[#allocation17_spill] sm:$0xff] %v3673_v41  ;;  %v375_v55 = vand.u32 4294901760, %v3673_v41  ;;  %v3691_v56 = vsub.f32 %v114_v28, %v3675_v44  ;;  %v3693_v57 = vand.u32 4294901760, %v120_v51  ;;  %v3697_v63 = vsub.f32 %v117_v32, %v3678_v45 }
  0x20   :  { %3004 = vmatmul.mubr.f32.gmra.mrb[8].mxu0 %v325_v46  ;;  %v366_v61 = vsub.f32 %v3667_v26, %v365_v34  ;;  %v570_v2 = vand.u32 4294901760, %v3684_v52  ;;  %v3703_v6 = vsub.f32 %v3475_v5, %v174_v9  ;;  %v123_v4 = vsel %vm67_vm0, %v42_v42, 0  ;;  %v43_v9 = vld [vmem:[%s4501_s0 + $0x98] sm:$0xff] }
  0x21   :  { %4547 = vst [vmem:[#allocation18_spill] sm:$0xff] %v3691_v56  ;;  %4548 = vst [vmem:[#allocation19_spill] sm:$0xff] %v3697_v63  ;;  %2836 = vmatmul.mubr.f32.gmra.mrb[8].mxu1 %v327_v19  ;;  %3006 = vmatprep.mubr.f32.mxu0 %v335_v54  ;;  %v376_v0 = vsub.f32 %v3673_v41, %v375_v55  ;;  %v4510_v1 = vand.u32 4294901760, %v3691_v56  ;;  %v3708_v46 = vsub.f32 %v120_v51, %v3693_v57  ;;  %vm2245_vm1 = vcmask 7168  }
  0x22   :  { %2838 = vmatprep.mubr.f32.mxu1 %v337_v33  ;;  %v357_v8 = vand.u32 4294901760, %v356_v40  ;;  %v4513_v18 = vand.u32 4294901760, %v3697_v63  ;;  %v571_v28 = vsub.f32 %v3684_v52, %v570_v2  ;;  %v577_v5 = vand.u32 4294901760, %v3703_v6  ;;  %v44_v33 = vld [vmem:[%s4501_s0 + $0xa0] sm:$0xff] }
  0x23   :  { %4549 = vst [vmem:[#allocation20_spill] sm:$0xff] %v3708_v46  ;;  %v367_v54 = vand.u32 4294901760, %v366_v61  ;;  %v386_v19 = vsub.f32 %v3691_v56, %v4510_v1  ;;  %v3721_v51 = vand.u32 4294901760, %v123_v4  ;;  %v45_v1 = vld [vmem:[%s4501_s0 + $0xa8] sm:$0xff]  ;;  %v377_v32 = vand.u32 4294901760, %v376_v0  ;;  %v47_v0 = vld [vmem:[%s4501_s0 + $0xb8] sm:$0xff] }
  0x24   :  { %3007 = vmatmul.mubr.f32.gmra.mrb[10].mxu0 %v345_v59  ;;  %v396_v40 = vsub.f32 %v3697_v63, %v4513_v18  ;;  %v572_v42 = vand.u32 4294901760, %v571_v28  ;;  %v578_v61 = vsub.f32 %v3703_v6, %v577_v5  ;;  %v3187_v41 = vpack.c.bf16 %v577_v5, %v570_v2  ;;  %v46_v28 = vld [vmem:[%s4501_s0 + $0xb0] sm:$0xff] }
  0x25   :  { %2839 = vmatmul.mubr.f32.gmra.mrb[10].mxu1 %v347_v53  ;;  %3009 = vmatprep.mubr.f32.mxu0 %v355_v12  ;;  %v387_v26 = vand.u32 4294901760, %v386_v19  ;;  %v3734_v60 = vsub.f32 %v123_v4, %v3721_v51  ;;  %v126_v59 = vsel %vm67_vm0, %v43_v9, 0  ;;  %v4551_v2 = vand.u32 4294901760, %v3708_v46 }
  0x26   :  { %2841 = vmatprep.mubr.f32.mxu1 %v357_v8  ;;  %v579_v18 = vand.u32 4294901760, %v578_v61  ;;  %3188 = vmatprep.subr.bf16.mxu0 %v3187_v41  ;;  %v3743_v53 = vand.u32 4294901760, %v126_v59  ;;  %v129_v12 = vsel %vm67_vm0, %v44_v33, 0  ;;  %v397_v4 = vand.u32 4294901760, %v396_v40  ;;  %v48_v61 = vld [vmem:[%s4501_s0 + $0xc0] sm:$0xff] }
  0x27   :  { %4550 = vst [vmem:[#allocation21_spill] sm:$0xff] %v3734_v60  ;;  %v406_v5 = vsub.f32 %v3708_v46, %v4551_v2  ;;  %v415_v9 = vand.u32 4294901760, %v3734_v60  ;;  %3190 = vmatpush3.bf16.msra.mxu0 %v3187_v41  ;;  %v3750_v19 = vand.u32 4294901760, %v129_v12  ;;  %v132_v8 = vsel %vm67_vm0, %v45_v1, 0 }
  0x28   :  { %3010 = vmatmul.mubr.f32.gmra.mrb[12].mxu0 %v365_v34  ;;  %v3163_v2 = vpack.c.bf16 %v579_v18, %v572_v42  ;;  %v3757_v33 = vsub.f32 %v126_v59, %v3743_v53  ;;  %v3759_v49 = vand.u32 4294901760, %v132_v8  ;;  %v135_v40 = vsel %vm67_vm0, %v46_v28, 0  ;;  %3192 = vmatprep.subr.bf16.mxu0 %v3493_v14  ;;  %v49_v18 = vld [vmem:[%s4501_s0 + $0xc8] sm:$0xff] }
  0x29   :  { %2842 = vmatmul.mubr.f32.gmra.mrb[12].mxu1 %v367_v54  ;;  %3012 = vmatprep.mubr.f32.mxu0 %v375_v55  ;;  %v416_v41 = vsub.f32 %v3734_v60, %v415_v9  ;;  %v3765_v1 = vsub.f32 %v129_v12, %v3750_v19  ;;  %v3767_v43 = vand.u32 4294901760, %v135_v40  ;;  %v138_v34 = vsel %vm67_vm0, %v47_v0, 0 }
  0x2a   :  { %4552 = vst [vmem:[#allocation22_spill] sm:$0xff] %v3757_v33  ;;  %2844 = vmatprep.mubr.f32.mxu1 %v377_v32  ;;  %3164 = vmatprep.subr.bf16.mxu1 %v3163_v2  ;;  %v425_v42 = vand.u32 4294901760, %v3757_v33  ;;  %v3775_v54 = vsub.f32 %v132_v8, %v3759_v49  ;;  %v3777_v55 = vand.u32 4294901760, %v138_v34  ;;  %v141_v59 = vsel %vm67_vm0, %v48_v61, 0  ;;  %v50_v32 = vld [vmem:[%s4501_s0 + $0xd0] sm:$0xff] }
  0x2b   :  { %4553 = vst [vmem:[#allocation23_spill] sm:$0xff] %v3765_v1  ;;  %3166 = vmatpush3.bf16.msra.mxu1 %v3163_v2  ;;  %v435_v28 = vand.u32 4294901760, %v3765_v1  ;;  %v3782_v12 = vsub.f32 %v135_v40, %v3767_v43  ;;  %v3784_v0 = vand.u32 4294901760, %v141_v59  ;;  %v4556_v60 = vand.u32 4294901760, %v3691_v56 }
  0x2c   :  { %4554 = vst [vmem:[#allocation24_spill] sm:$0xff] %v3775_v54  ;;  %v407_v8 = vand.u32 4294901760, %v406_v5  ;;  %v445_v36 = vand.u32 4294901760, %v3775_v54  ;;  %v3793_v61 = vsub.f32 %v138_v34, %v3777_v55  ;;  %v144_v2 = vsel %vm67_vm0, %v49_v18, 0  ;;  %v51_v5 = vld [vmem:[%s4501_s0 + $0xd8] sm:$0xff] }
  0x2d   :  { %4555 = vst [vmem:[#allocation25_spill] sm:$0xff] %v3782_v12  ;;  %3013 = vmatmul.mubr.f32.gmra.mrb[14].mxu0 %v4556_v60  ;;  %2845 = vmatmul.mubr.f32.gmra.mrb[14].mxu1 %v387_v26  ;;  %v4558_v40 = vand.u32 4294901760, %v3697_v63  ;;  %v426_v30 = vsub.f32 %v3757_v33, %v425_v42  ;;  %v455_v22 = vand.u32 4294901760, %v3782_v12  ;;  %v3801_v10 = vsub.f32 %v141_v59, %v3784_v0  ;;  %v52_v59 = vld [vmem:[%s4501_s0 + $0xe0] sm:$0xff]  ;;  %v53_v63 = vld [vmem:[%s4501_s0 + $0xe8] sm:$0xff] }
  0x2e   :  { %4557 = vst [vmem:[#allocation26_spill] sm:$0xff] %v3793_v61  ;;  %v3803_v60 = vand.u32 4294901760, %v144_v2  ;;  %2847 = vmatprep.mubr.f32.mxu1 %v397_v4  ;;  %v417_v34 = vand.u32 4294901760, %v416_v41  ;;  %v436_v26 = vsub.f32 %v3765_v1, %v435_v28  ;;  %v147_v18 = vsel %vm67_vm0, %v50_v32, 0 }
  0x2f   :  { %3015 = vmatprep.mubr.f32.mxu0 %v4558_v40  ;;  %4559 = vst [vmem:[#allocation27_spill] sm:$0xff] %v3801_v10  ;;  %v446_v40 = vsub.f32 %v3775_v54, %v445_v36  ;;  %v465_v33 = vand.u32 4294901760, %v3793_v61  ;;  %v4560_v56 = vand.u32 4294901760, %v3708_v46  ;;  %v456_v4 = vsub.f32 %v3782_v12, %v455_v22 }
  0x30   :  { %v475_v41 = vand.u32 4294901760, %v3801_v10  ;;  %v3822_v32 = vand.u32 4294901760, %v147_v18  ;;  %v150_v54 = vsel %vm67_vm0, %v51_v5, 0  ;;  %v427_v1 = vand.u32 4294901760, %v426_v30 }
  0x31   :  { %3016 = vmatmul.mubr.f32.gmra.mrb[16].mxu0 %v4560_v56  ;;  %2848 = vmatmul.mubr.f32.gmra.mrb[16].mxu1 %v407_v8  ;;  %v3826_v58 = vsub.f32 %v144_v2, %v3803_v60  ;;  %v3828_v47 = vand.u32 4294901760, %v150_v54  ;;  %v54_v56 = vld [vmem:[%s4501_s0 + $0xf0] sm:$0xff]  ;;  %v437_v12 = vand.u32 4294901760, %v436_v26  ;;  %v153_v38 = vsel %vm67_vm0, %v52_v59, 0  ;;  %v55_v2 = vld [vmem:[%s4501_s0 + $0xf8] sm:$0xff] }
  0x32   :  { %3018 = vmatprep.mubr.f32.mxu0 %v415_v9  ;;  %2850 = vmatprep.mubr.f32.mxu1 %v417_v34  ;;  %v3834_v46 = vsub.f32 %v147_v18, %v3822_v32  ;;  %v156_v8 = vsel %vm67_vm0, %v53_v63, 0  ;;  %v447_v9 = vand.u32 4294901760, %v446_v40  ;;  %v3838_v30 = vand.u32 4294901760, %v153_v38 }
  0x33   :  { %v457_v5 = vand.u32 4294901760, %v456_v4  ;;  %v466_v35 = vsub.f32 %v3793_v61, %v465_v33  ;;  %v476_v34 = vsub.f32 %v3801_v10, %v475_v41  ;;  %v159_v26 = vsel %vm67_vm0, %v54_v56, 0 }
  0x34   :  { %v485_v18 = vand.u32 4294901760, %v3826_v58  ;;  %v495_v63 = vand.u32 4294901760, %v3834_v46  ;;  %v3849_v40 = vsub.f32 %v150_v54, %v3828_v47  ;;  %v3851_v59 = vand.u32 4294901760, %v156_v8 }
  0x35   :  { %3019 = vmatmul.mubr.f32.gmra.mrb[18].mxu0 %v425_v42  ;;  %2851 = vmatmul.mubr.f32.gmra.mrb[18].mxu1 %v427_v1  ;;  %v3854_v42 = vsub.f32 %v153_v38, %v3838_v30  ;;  %v3856_v4 = vand.u32 4294901760, %v159_v26  ;;  %v162_v10 = vsel %vm67_vm0, %v55_v2, 0  ;;  %v3167_v1 = vpack.c.bf16 %v3513_v21, %v3499_v17 }
  0x36   :  { %3021 = vmatprep.mubr.f32.mxu0 %v435_v28  ;;  %2853 = vmatprep.mubr.f32.mxu1 %v437_v12  ;;  %v467_v28 = vand.u32 4294901760, %v466_v35  ;;  %v486_v54 = vsub.f32 %v3826_v58, %v485_v18  ;;  %v505_v56 = vand.u32 4294901760, %v3849_v40  ;;  %v3864_v12 = vsub.f32 %v156_v8, %v3851_v59 }
  0x37   :  { %3168 = vmatprep.subr.bf16.mxu1 %v3167_v1  ;;  %v3866_v38 = vand.u32 4294901760, %v162_v10  ;;  %v477_v61 = vand.u32 4294901760, %v476_v34  ;;  %v496_v2 = vsub.f32 %v3834_v46, %v495_v63  ;;  %v515_v17 = vand.u32 4294901760, %v3854_v42 }
  0x38   :  { %v3871_v21 = vsub.f32 %v159_v26, %v3856_v4  ;;  %v487_v35 = vand.u32 4294901760, %v486_v54 }
  0x39   :  { %3022 = vmatmul.mubr.f32.gmra.mrb[20].mxu0 %v445_v36  ;;  %2854 = vmatmul.mubr.f32.gmra.mrb[20].mxu1 %v447_v9  ;;  %v525_v36 = vand.u32 4294901760, %v3864_v12  ;;  %v3876_v8 = vsub.f32 %v162_v10, %v3866_v38  ;;  %v497_v9 = vand.u32 4294901760, %v496_v2 }
  0x3a   :  { %3024 = vmatprep.mubr.f32.mxu0 %v455_v22  ;;  %2856 = vmatprep.mubr.f32.mxu1 %v457_v5  ;;  %v506_v22 = vsub.f32 %v3849_v40, %v505_v56  ;;  %v516_v5 = vsub.f32 %v3854_v42, %v515_v17  ;;  %v535_v34 = vand.u32 4294901760, %v3871_v21 }
  0x3b   :  { %v545_v26 = vand.u32 4294901760, %v3876_v8 }
  0x3c   :  { %v536_v54 = vsub.f32 %v3871_v21, %v535_v34 }
  0x3d   :  { %3025 = vmatmul.mubr.f32.gmra.mrb[22].mxu0 %v465_v33  ;;  %2857 = vmatmul.mubr.f32.gmra.mrb[22].mxu1 %v467_v28  ;;  %v507_v33 = vand.u32 4294901760, %v506_v22  ;;  %v517_v28 = vand.u32 4294901760, %v516_v5 }
  0x3e   :  { %3027 = vmatprep.mubr.f32.mxu0 %v475_v41  ;;  %2859 = vmatprep.mubr.f32.mxu1 %v477_v61  ;;  %v526_v41 = vsub.f32 %v3864_v12, %v525_v36  ;;  %v546_v61 = vsub.f32 %v3876_v8, %v545_v26  ;;  %v537_v2 = vand.u32 4294901760, %v536_v54 }
  0x40   :  { %v527_v10 = vand.u32 4294901760, %v526_v41 }
  0x41   :  { %3028 = vmatmul.mubr.f32.gmra.mrb[24].mxu0 %v485_v18  ;;  %2860 = vmatmul.mubr.f32.gmra.mrb[24].mxu1 %v487_v35  ;;  %v547_v18 = vand.u32 4294901760, %v546_v61 }
  0x42   :  { %3030 = vmatprep.mubr.f32.mxu0 %v495_v63  ;;  %2862 = vmatprep.mubr.f32.mxu1 %v497_v9  ;;  %v3171_v63 = vpack.c.bf16 %v3703_v6, %v3684_v52  ;;  %v4563_v52 = vld [vmem:[#allocation7_spill] sm:$0xff] }
  0x45   :  { %3031 = vmatmul.mubr.f32.gmra.mrb[26].mxu0 %v505_v56  ;;  %2863 = vmatmul.mubr.f32.gmra.mrb[26].mxu1 %v507_v33 }
  0x46   :  { %3033 = vmatprep.mubr.f32.mxu0 %v515_v17  ;;  %2865 = vmatprep.mubr.f32.mxu1 %v517_v28 }
  0x49   :  { %3034 = vmatmul.mubr.f32.gmra.mrb[28].mxu0 %v525_v36  ;;  %2866 = vmatmul.mubr.f32.gmra.mrb[28].mxu1 %v527_v10 }
  0x4a   :  { %3036 = vmatprep.mubr.f32.mxu0 %v535_v34  ;;  %2868 = vmatprep.mubr.f32.mxu1 %v537_v2 }
  0x4d   :  { %3037 = vmatmul.mubr.f32.gmra.mrb[30].mxu0 %v545_v26  ;;  %2869 = vmatmul.mubr.f32.gmra.mrb[30].mxu1 %v547_v18 }
  0x4e   :  { %3047 = vmatprep.mubr.f32.mxu0 %v3495_v15  ;;  %2879 = vmatprep.mubr.f32.mxu1 %v3495_v15 }
  0x51   :  { %3048 = vmatmul.mubr.f32.vlgmr.msra.gmra.mrb[0].mxu0 %v3497_v16  ;;  %2880 = vmatmul.mubr.f32.vlgmr.msra.gmra.mrb[0].mxu1 %v3497_v16 }
  0x52   :  { %3050 = vmatprep.mubr.f32.mxu0 %v3526_v27  ;;  %3170 = vmatpush3.bf16.msra.mxu1 %v3167_v1 }
  0x53   :  { %2882 = vmatprep.mubr.f32.mxu1 %v3526_v27  ;;  %3194 = vmatpush3.bf16.msra.mxu0 %v3493_v14  ;;  %v4561_v14 = vld [vmem:[#allocation5_spill] sm:$0xff] }
  0x54   :  { %3172 = vmatprep.subr.bf16.mxu1 %v3171_v63  ;;  %3196 = vmatprep.subr.bf16.mxu0 %v3511_v20 }
  0x55   :  { %3051 = vmatmul.mubr.f32.gmra.mrb[2].mxu0 %v3531_v29  ;;  %2883 = vmatmul.mubr.f32.gmra.mrb[2].mxu1 %v3531_v29 }
  0x56   :  { %3053 = vmatprep.mubr.f32.mxu0 %v3547_v39  ;;  %2885 = vmatprep.mubr.f32.mxu1 %v3547_v39 }
  0x57   :  { %3174 = vmatpush3.bf16.msra.mxu1 %v3171_v63  ;;  %3198 = vmatpush3.bf16.msra.mxu0 %v3511_v20  ;;  %v4562_v20 = vld [vmem:[#allocation6_spill] sm:$0xff] }
  0x59   :  { %3054 = vmatmul.mubr.f32.gmra.mrb[4].mxu0 %v3561_v48  ;;  %2886 = vmatmul.mubr.f32.gmra.mrb[4].mxu1 %v3561_v48 }
  0x5a   :  { %3056 = vmatprep.mubr.f32.mxu0 %v3582_v62  ;;  %2888 = vmatprep.mubr.f32.mxu1 %v3582_v62 }
  0x5d   :  { %3057 = vmatmul.mubr.f32.gmra.mrb[6].mxu0 %v3588_v7  ;;  %2889 = vmatmul.mubr.f32.gmra.mrb[6].mxu1 %v3588_v7 }
  0x5e   :  { %3059 = vmatprep.mubr.f32.mxu0 %v3596_v11  ;;  %2891 = vmatprep.mubr.f32.mxu1 %v3596_v11 }
  0x61   :  { %3060 = vmatmul.mubr.f32.gmra.mrb[8].mxu0 %v3604_v23  ;;  %2892 = vmatmul.mubr.f32.gmra.mrb[8].mxu1 %v3604_v23 }
  0x62   :  { %3062 = vmatprep.mubr.f32.mxu0 %v3613_v31  ;;  %2894 = vmatprep.mubr.f32.mxu1 %v3613_v31 }
  0x65   :  { %3063 = vmatmul.mubr.f32.gmra.mrb[10].mxu0 %v3620_v37  ;;  %2895 = vmatmul.mubr.f32.gmra.mrb[10].mxu1 %v3620_v37 }
  0x66   :  { %3065 = vmatprep.mubr.f32.mxu0 %v3636_v50  ;;  %2897 = vmatprep.mubr.f32.mxu1 %v3636_v50 }
  0x69   :  { %3066 = vmatmul.mubr.f32.gmra.mrb[12].mxu0 %v3656_v3  ;;  %2898 = vmatmul.mubr.f32.gmra.mrb[12].mxu1 %v3656_v3 }
  0x6a   :  { %3068 = vmatprep.mubr.f32.mxu0 %v3661_v13  ;;  %2900 = vmatprep.mubr.f32.mxu1 %v3661_v13 }
  0x6d   :  { %3069 = vmatmul.mubr.f32.gmra.mrb[14].mxu0 %v3675_v44  ;;  %2901 = vmatmul.mubr.f32.gmra.mrb[14].mxu1 %v3675_v44 }
  0x6e   :  { %3071 = vmatprep.mubr.f32.mxu0 %v3678_v45  ;;  %2903 = vmatprep.mubr.f32.mxu1 %v3678_v45 }
  0x71   :  { %3072 = vmatmul.mubr.f32.gmra.mrb[16].mxu0 %v3693_v57  ;;  %2904 = vmatmul.mubr.f32.gmra.mrb[16].mxu1 %v3693_v57 }
  0x72   :  { %3074 = vmatprep.mubr.f32.mxu0 %v3721_v51  ;;  %2906 = vmatprep.mubr.f32.mxu1 %v3721_v51 }
  0x75   :  { %3075 = vmatmul.mubr.f32.gmra.mrb[18].mxu0 %v3743_v53  ;;  %2907 = vmatmul.mubr.f32.gmra.mrb[18].mxu1 %v3743_v53 }
  0x76   :  { %3077 = vmatprep.mubr.f32.mxu0 %v3750_v19  ;;  %2909 = vmatprep.mubr.f32.mxu1 %v3750_v19 }
  0x79   :  { %3078 = vmatmul.mubr.f32.gmra.mrb[20].mxu0 %v3759_v49  ;;  %2910 = vmatmul.mubr.f32.gmra.mrb[20].mxu1 %v3759_v49 }
  0x7a   :  { %3080 = vmatprep.mubr.f32.mxu0 %v3767_v43  ;;  %2912 = vmatprep.mubr.f32.mxu1 %v3767_v43 }
  0x7d   :  { %3081 = vmatmul.mubr.f32.gmra.mrb[22].mxu0 %v3777_v55  ;;  %2913 = vmatmul.mubr.f32.gmra.mrb[22].mxu1 %v3777_v55 }
  0x7e   :  { %3083 = vmatprep.mubr.f32.mxu0 %v3784_v0  ;;  %2915 = vmatprep.mubr.f32.mxu1 %v3784_v0 }
  0x81   :  { %3084 = vmatmul.mubr.f32.gmra.mrb[24].mxu0 %v3803_v60  ;;  %2916 = vmatmul.mubr.f32.gmra.mrb[24].mxu1 %v3803_v60 }
  0x82   :  { %3086 = vmatprep.mubr.f32.mxu0 %v3822_v32  ;;  %2918 = vmatprep.mubr.f32.mxu1 %v3822_v32 }
  0x85   :  { %3087 = vmatmul.mubr.f32.gmra.mrb[26].mxu0 %v3828_v47  ;;  %2919 = vmatmul.mubr.f32.gmra.mrb[26].mxu1 %v3828_v47 }
  0x86   :  { %3089 = vmatprep.mubr.f32.mxu0 %v3838_v30  ;;  %2921 = vmatprep.mubr.f32.mxu1 %v3838_v30 }
  0x89   :  { %3090 = vmatmul.mubr.f32.gmra.mrb[28].mxu0 %v3851_v59  ;;  %2922 = vmatmul.mubr.f32.gmra.mrb[28].mxu1 %v3851_v59 }
  0x8a   :  { %3092 = vmatprep.mubr.f32.mxu0 %v3856_v4  ;;  %2924 = vmatprep.mubr.f32.mxu1 %v3856_v4 }
  0x8d   :  { %3093 = vmatmul.mubr.f32.gmra.mrb[30].mxu0 %v3866_v38  ;;  %2925 = vmatmul.mubr.f32.gmra.mrb[30].mxu1 %v3866_v38 }
  0x8e   :  { %3103 = vmatprep.mubr.f32.mxu0 %v3495_v15  ;;  %2935 = vmatprep.mubr.f32.mxu1 %v3520_v24  ;;  %v4564_v15 = vld [vmem:[#allocation8_spill] sm:$0xff]  ;;  %v4566_v24 = vld [vmem:[#allocation10_spill] sm:$0xff] }
  0x91   :  { %3104 = vmatmul.mubr.f32.vlgmr.msra.gmra.mrb[0].mxu0 %v3497_v16  ;;  %2936 = vmatmul.mubr.f32.vlgmr.msra.gmra.mrb[0].mxu1 %v3523_v25  ;;  %v4565_v16 = vld [vmem:[#allocation9_spill] sm:$0xff]  ;;  %v4567_v25 = vld [vmem:[#allocation11_spill] sm:$0xff] }
  0x92   :  { %3106 = vmatprep.mubr.f32.mxu0 %v3526_v27  ;;  %2938 = vmatprep.mubr.f32.mxu1 %v4561_v14  ;;  %v4568_v27 = vld [vmem:[#allocation12_spill] sm:$0xff] }
  0x95   :  { %3107 = vmatmul.mubr.f32.gmra.mrb[2].mxu0 %v3531_v29  ;;  %2939 = vmatmul.mubr.f32.gmra.mrb[2].mxu1 %v4562_v20  ;;  %v4569_v29 = vld [vmem:[#allocation13_spill] sm:$0xff] }
  0x96   :  { %3109 = vmatprep.mubr.f32.mxu0 %v3547_v39  ;;  %2941 = vmatprep.mubr.f32.mxu1 %v4563_v52  ;;  %v4570_v39 = vld [vmem:[#allocation14_spill] sm:$0xff] }
  0x99   :  { %3110 = vmatmul.mubr.f32.gmra.mrb[4].mxu0 %v3561_v48  ;;  %2942 = vmatmul.mubr.f32.gmra.mrb[4].mxu1 %v4564_v15  ;;  %v4571_v48 = vld [vmem:[#allocation15_spill] sm:$0xff] }
  0x9a   :  { %3112 = vmatprep.mubr.f32.mxu0 %v3582_v62  ;;  %2944 = vmatprep.mubr.f32.mxu1 %v4565_v16  ;;  %v4572_v62 = vld [vmem:[#allocation16_spill] sm:$0xff] }
  0x9d   :  { %3113 = vmatmul.mubr.f32.gmra.mrb[6].mxu0 %v3588_v7  ;;  %2945 = vmatmul.mubr.f32.gmra.mrb[6].mxu1 %v4566_v24  ;;  %v4573_v7 = vld [vmem:[#allocation17_spill] sm:$0xff] }
  0x9e   :  { %3115 = vmatprep.mubr.f32.mxu0 %v3596_v11  ;;  %2947 = vmatprep.mubr.f32.mxu1 %v4567_v25  ;;  %v4574_v11 = vld [vmem:[#allocation18_spill] sm:$0xff] }
  0xa1   :  { %3116 = vmatmul.mubr.f32.gmra.mrb[8].mxu0 %v3604_v23  ;;  %2948 = vmatmul.mubr.f32.gmra.mrb[8].mxu1 %v4568_v27  ;;  %v4575_v23 = vld [vmem:[#allocation19_spill] sm:$0xff] }
  0xa2   :  { %3118 = vmatprep.mubr.f32.mxu0 %v3613_v31  ;;  %2950 = vmatprep.mubr.f32.mxu1 %v4569_v29  ;;  %v4576_v31 = vld [vmem:[#allocation20_spill] sm:$0xff] }
  0xa5   :  { %3119 = vmatmul.mubr.f32.gmra.mrb[10].mxu0 %v3620_v37  ;;  %2951 = vmatmul.mubr.f32.gmra.mrb[10].mxu1 %v4570_v39  ;;  %v4577_v37 = vld [vmem:[#allocation21_spill] sm:$0xff] }
  0xa6   :  { %3121 = vmatprep.mubr.f32.mxu0 %v3636_v50  ;;  %2953 = vmatprep.mubr.f32.mxu1 %v4571_v48  ;;  %v4578_v50 = vld [vmem:[#allocation22_spill] sm:$0xff] }
  0xa9   :  { %3122 = vmatmul.mubr.f32.gmra.mrb[12].mxu0 %v3656_v3  ;;  %2954 = vmatmul.mubr.f32.gmra.mrb[12].mxu1 %v4572_v62  ;;  %v4579_v3 = vld [vmem:[#allocation23_spill] sm:$0xff] }
  0xaa   :  { %3124 = vmatprep.mubr.f32.mxu0 %v3661_v13  ;;  %2956 = vmatprep.mubr.f32.mxu1 %v4573_v7  ;;  %v4580_v13 = vld [vmem:[#allocation24_spill] sm:$0xff] }
  0xad   :  { %3125 = vmatmul.mubr.f32.gmra.mrb[14].mxu0 %v3675_v44  ;;  %2957 = vmatmul.mubr.f32.gmra.mrb[14].mxu1 %v4574_v11  ;;  %v4581_v44 = vld [vmem:[#allocation25_spill] sm:$0xff] }
  0xae   :  { %3127 = vmatprep.mubr.f32.mxu0 %v3678_v45  ;;  %2959 = vmatprep.mubr.f32.mxu1 %v4575_v23  ;;  %v4582_v45 = vld [vmem:[#allocation26_spill] sm:$0xff] }
  0xb1   :  { %3128 = vmatmul.mubr.f32.gmra.mrb[16].mxu0 %v3693_v57  ;;  %2960 = vmatmul.mubr.f32.gmra.mrb[16].mxu1 %v4576_v31  ;;  %v4583_v57 = vld [vmem:[#allocation27_spill] sm:$0xff] }
  0xb2   :  { %3130 = vmatprep.mubr.f32.mxu0 %v3721_v51  ;;  %2962 = vmatprep.mubr.f32.mxu1 %v4577_v37 }
  0xb5   :  { %3131 = vmatmul.mubr.f32.gmra.mrb[18].mxu0 %v3743_v53  ;;  %2963 = vmatmul.mubr.f32.gmra.mrb[18].mxu1 %v4578_v50  ;;  %v4027_v53 = vld [vmem:[%s4505_s4] ss:$0 sm:$0xff] }
  0xb6   :  { %3133 = vmatprep.mubr.f32.mxu0 %v3750_v19  ;;  %2965 = vmatprep.mubr.f32.mxu1 %v4579_v3  ;;  %v4032_v19 = vld [vmem:[%s4504_s3] ss:$0 sm:$0xff] }
  0xb9   :  { %3134 = vmatmul.mubr.f32.gmra.mrb[20].mxu0 %v3759_v49  ;;  %2966 = vmatmul.mubr.f32.gmra.mrb[20].mxu1 %v4580_v13 }
  0xba   :  { %3136 = vmatprep.mubr.f32.mxu0 %v3767_v43  ;;  %2968 = vmatprep.mubr.f32.mxu1 %v4581_v44 }
  0xbd   :  { %3137 = vmatmul.mubr.f32.gmra.mrb[22].mxu0 %v3777_v55  ;;  %2969 = vmatmul.mubr.f32.gmra.mrb[22].mxu1 %v4582_v45 }
  0xbe   :  { %3139 = vmatprep.mubr.f32.mxu0 %v3784_v0  ;;  %2971 = vmatprep.mubr.f32.mxu1 %v4583_v57 }
  0xc1   :  { %3140 = vmatmul.mubr.f32.gmra.mrb[24].mxu0 %v3803_v60  ;;  %2972 = vmatmul.mubr.f32.gmra.mrb[24].mxu1 %v3826_v58 }
  0xc2   :  { %3142 = vmatprep.mubr.f32.mxu0 %v3822_v32  ;;  %2974 = vmatprep.mubr.f32.mxu1 %v3834_v46 }
  0xc5   :  { %3143 = vmatmul.mubr.f32.gmra.mrb[26].mxu0 %v3828_v47  ;;  %2975 = vmatmul.mubr.f32.gmra.mrb[26].mxu1 %v3849_v40  ;;  %v4020_v47 = vld [vmem:[%s4503_s2] ss:$0 sm:$0xff]  ;;  %s3418_s2 = smov [#allocation2]  }
  0xc6   :  { %3145 = vmatprep.mubr.f32.mxu0 %v3838_v30  ;;  %2977 = vmatprep.mubr.f32.mxu1 %v3854_v42  ;;  %s2418_s3 = sshll.u32 %s3418_s2, 4  ;;  %s2419_s3 = int_to_ptr.vmem [resolvable:$true] %s2418_s3 }
  0xc7   :  { %s3394_s4 = scalar_lea.vmem %s2419_s3, 2048  ;;  %p3399_p1 = scmp.lt.s32.totalorder %s2419_s3, %s2419_s3 }
  0xc8   :  { %p3395_p0 = scmp.ne.s32.totalorder %s2419_s3, %s3394_s4  ;;  %p3400_p2 = scmp.lt.s32.totalorder %s3394_s4, %s3394_s4 }
  0xc9   :  { %3146 = vmatmul.mubr.f32.gmra.mrb[28].mxu0 %v3851_v59  ;;  %2978 = vmatmul.mubr.f32.gmra.mrb[28].mxu1 %v3864_v12 }
  0xca   :  { %3148 = vmatprep.mubr.f32.mxu0 %v3856_v4  ;;  %2980 = vmatprep.mubr.f32.mxu1 %v3871_v21  ;;  %p3401_p3 = por %p3400_p2, %p3399_p1 }
  0xcc   :  { %p3402_p4 = pnand %p3401_p3, %p3395_p0 }
  0xcd   :  { %3149 = vmatmul.mubr.f32.gmra.mrb[30].mxu0 %v3866_v38  ;;  %2981 = vmatmul.mubr.f32.gmra.mrb[30].mxu1 %v3876_v8 }
 0x164   :  { %v3105_v58 = vpop.f32.mrb[0].mxu0  ;;  %v2937_v43 = vpop.f32.mrb[0].mxu1 }
 0x165   :  { %v1792_v49 = vpop.f32.mrb[1].mxu0  ;;  %v3199_v6 = vadd.f32 %v2937_v43, %v4020_v47  ;;  %v906_v46 = vpop.f32.mrb[1].mxu1 }
 0x166   :  { %v3201_v51 = vadd.f32 %v4020_v47, %v906_v46 }
 0x167   :  { %v3200_v55 = vadd.f32 %v3199_v6, %v3105_v58 }
 0x168   :  { %v3108_v0 = vpop.f32.mrb[2].mxu0  ;;  %v3202_v60 = vadd.f32 %v3201_v51, %v1792_v49  ;;  %v2940_v32 = vpop.f32.mrb[2].mxu1 }
 0x169   :  { %v1804_v30 = vpop.f32.mrb[3].mxu0  ;;  %v3203_v40 = vadd.f32 %v2940_v32, %v4020_v47  ;;  %v920_v59 = vpop.f32.mrb[3].mxu1  ;;  %v2286_v42 = vmul.f32 %v3200_v55, %v4027_v53  ;;  %v2150_v4 = vmul.f32 %v3200_v55, %v4032_v19 }
 0x16a   :  { %v2507_v1 = vpack.c.bf16 %v3200_v55, %v3202_v60  ;;  %v3205_v56 = vadd.f32 %v4020_v47, %v920_v59  ;;  %v2149_v8 = vmul.f32 %v3202_v60, %v4032_v19  ;;  %v2285_v2 = vmul.f32 %v3202_v60, %v4027_v53 }
 0x16b   :  { %v3204_v12 = vadd.f32 %v3203_v40, %v3108_v0  ;;  %2319 = vadd.xlane.f32.xlu1 %v2286_v42  ;;  %2183 = vadd.xlane.f32.xlu0 %v2150_v4 }
 0x16c   :  { %v3111_v38 = vpop.f32.mrb[4].mxu0  ;;  %2508 = vst [vmem:[#allocation2] sm:$0xff] %v2507_v1   ;;  %v3206_v17 = vadd.f32 %v3205_v56, %v1804_v30  ;;  %v2943_v21 = vpop.f32.mrb[4].mxu1 }
 0x16d   :  { %v1816_v35 = vpop.f32.mrb[5].mxu0  ;;  %v3207_v22 = vadd.f32 %v2943_v21, %v4020_v47  ;;  %v934_v36 = vpop.f32.mrb[5].mxu1  ;;  %v2152_v9 = vmul.f32 %v3204_v12, %v4032_v19  ;;  %v2288_v18 = vmul.f32 %v3204_v12, %v4027_v53 }
 0x16e   :  { %v2512_v5 = vpack.c.bf16 %v3204_v12, %v3206_v17  ;;  %v3209_v34 = vadd.f32 %v4020_v47, %v934_v36  ;;  %v2287_v29 = vmul.f32 %v3206_v17, %v4027_v53  ;;  %v2151_v39 = vmul.f32 %v3206_v17, %v4032_v19 }
 0x16f   :  { %v3208_v33 = vadd.f32 %v3207_v22, %v3111_v38  ;;  %2181 = vadd.xlane.f32.xlu0 %v2149_v8  ;;  %2187 = vadd.xlane.f32.xlu1 %v2152_v9 }
 0x170   :  { %v3114_v41 = vpop.f32.mrb[6].mxu0  ;;  %2584 = vst [vmem:[#allocation2 + $0x8] sm:$0xff] %v2512_v5   ;;  %v3210_v26 = vadd.f32 %v3209_v34, %v1816_v35  ;;  %v2946_v28 = vpop.f32.mrb[6].mxu1 }
 0x171   :  { %v1828_v54 = vpop.f32.mrb[7].mxu0  ;;  %v3211_v10 = vadd.f32 %v2946_v28, %v4020_v47  ;;  %v948_v61 = vpop.f32.mrb[7].mxu1  ;;  %v2154_v13 = vmul.f32 %v3208_v33, %v4032_v19  ;;  %v2290_v0 = vmul.f32 %v3208_v33, %v4027_v53 }
 0x172   :  { %v2517_v63 = vpack.c.bf16 %v3208_v33, %v3210_v26  ;;  %v3213_v14 = vadd.f32 %v4020_v47, %v948_v61  ;;  %v2153_v44 = vmul.f32 %v3210_v26, %v4032_v19  ;;  %v2289_v60 = vmul.f32 %v3210_v26, %v4027_v53 }
 0x173   :  { %v4046_v20 = vadd.f32 %v3211_v10, %v3114_v41  ;;  %2317 = vadd.xlane.f32.xlu0 %v2285_v2  ;;  %2323 = vadd.xlane.f32.xlu1 %v2288_v18 }
 0x174   :  { %v3117_v52 = vpop.f32.mrb[8].mxu0  ;;  %2585 = vst [vmem:[#allocation2 + $0x10] sm:$0xff] %v2517_v63   ;;  %v3214_v15 = vadd.f32 %v3213_v14, %v1828_v54  ;;  %v2949_v16 = vpop.f32.mrb[8].mxu1 }
 0x175   :  { %v1840_v24 = vpop.f32.mrb[9].mxu0  ;;  %v3215_v25 = vadd.f32 %v2949_v16, %v4020_v47  ;;  %v962_v27 = vpop.f32.mrb[9].mxu1  ;;  %v2156_v38 = vmul.f32 %v4046_v20, %v4032_v19  ;;  %v2292_v41 = vmul.f32 %v4046_v20, %v4027_v53 }
 0x176   :  { %v2522_v48 = vpack.c.bf16 %v4046_v20, %v3214_v15  ;;  %v3217_v62 = vadd.f32 %v4020_v47, %v962_v27  ;;  %v2155_v17 = vmul.f32 %v3214_v15, %v4032_v19  ;;  %v2291_v26 = vmul.f32 %v3214_v15, %v4027_v53 }
 0x177   :  { %v4053_v7 = vadd.f32 %v3215_v25, %v3117_v52  ;;  %2321 = vadd.xlane.f32.xlu0 %v2287_v29  ;;  %2185 = vadd.xlane.f32.xlu1 %v2151_v39 }
 0x178   :  { %v3120_v11 = vpop.f32.mrb[10].mxu0  ;;  %2586 = vst [vmem:[#allocation2 + $0x18] sm:$0xff] %v2522_v48   ;;  %v4055_v23 = vadd.f32 %v3217_v62, %v1840_v24  ;;  %v2952_v31 = vpop.f32.mrb[10].mxu1 }
 0x179   :  { %v1852_v37 = vpop.f32.mrb[11].mxu0  ;;  %v3219_v50 = vadd.f32 %v2952_v31, %v4020_v47  ;;  %v976_v3 = vpop.f32.mrb[11].mxu1  ;;  %v2158_v14 = vmul.f32 %v4053_v7, %v4032_v19 }
 0x17a   :  { %v2527_v45 = vpack.c.bf16 %v4053_v7, %v4055_v23  ;;  %v3221_v57 = vadd.f32 %v4020_v47, %v976_v3  ;;  %v2157_v15 = vmul.f32 %v4055_v23, %v4032_v19 }
 0x17b   :  { %v4063_v58 = vadd.f32 %v3219_v50, %v3120_v11  ;;  %2191 = vadd.xlane.f32.xlu1 %v2154_v13  ;;  %2189 = vadd.xlane.f32.xlu0 %v2153_v44  ;;  %v2294_v50 = vmul.f32 %v4053_v7, %v4027_v53  ;;  %v2293_v44 = vmul.f32 %v4055_v23, %v4027_v53 }
 0x17c   :  { %v3123_v43 = vpop.f32.mrb[12].mxu0  ;;  %2587 = vst [vmem:[#allocation2 + $0x20] sm:$0xff] %v2527_v45   ;;  %v4065_v49 = vadd.f32 %v3221_v57, %v1852_v37  ;;  %v2955_v6 = vpop.f32.mrb[12].mxu1 }
 0x17d   :  { %v1864_v46 = vpop.f32.mrb[13].mxu0  ;;  %v3223_v51 = vadd.f32 %v2955_v6, %v4020_v47  ;;  %v990_v55 = vpop.f32.mrb[13].mxu1 }
 0x17e   :  { %v2532_v32 = vpack.c.bf16 %v4063_v58, %v4065_v49  ;;  %v3225_v30 = vadd.f32 %v4020_v47, %v990_v55 }
 0x17f   :  { %v4073_v40 = vadd.f32 %v3223_v51, %v3123_v43  ;;  %2327 = vadd.xlane.f32.xlu1 %v2290_v0  ;;  %2325 = vadd.xlane.f32.xlu0 %v2289_v60 }
 0x180   :  { %v3126_v59 = vpop.f32.mrb[14].mxu0  ;;  %2588 = vst [vmem:[#allocation2 + $0x28] sm:$0xff] %v2532_v32   ;;  %v4075_v42 = vadd.f32 %v3225_v30, %v1864_v46  ;;  %v2958_v4 = vpop.f32.mrb[14].mxu1  ;;  %v2160_v32 = vmul.f32 %v4063_v58, %v4032_v19 }
 0x181   :  { %v1876_v1 = vpop.f32.mrb[15].mxu0  ;;  %v3227_v56 = vadd.f32 %v2958_v4, %v4020_v47  ;;  %v1004_v12 = vpop.f32.mrb[15].mxu1  ;;  %v2159_v4 = vmul.f32 %v4065_v49, %v4032_v19 }
 0x182   :  { %v2537_v21 = vpack.c.bf16 %v4073_v40, %v4075_v42  ;;  %v3229_v35 = vadd.f32 %v4020_v47, %v1004_v12 }
 0x183   :  { %v4084_v22 = vadd.f32 %v3227_v56, %v3126_v59  ;;  %2195 = vadd.xlane.f32.xlu1 %v2156_v38  ;;  %2193 = vadd.xlane.f32.xlu0 %v2155_v17 }
 0x184   :  { %v3129_v36 = vpop.f32.mrb[16].mxu0  ;;  %2589 = vst [vmem:[#allocation2 + $0x30] sm:$0xff] %v2537_v21   ;;  %v4086_v8 = vadd.f32 %v3229_v35, %v1876_v1  ;;  %v2961_v9 = vpop.f32.mrb[16].mxu1 }
 0x185   :  { %v1888_v5 = vpop.f32.mrb[17].mxu0  ;;  %v3231_v34 = vadd.f32 %v2961_v9, %v4020_v47  ;;  %v1018_v33 = vpop.f32.mrb[17].mxu1 }
 0x186   :  { %v2542_v28 = vpack.c.bf16 %v4084_v22, %v4086_v8  ;;  %v3233_v54 = vadd.f32 %v4020_v47, %v1018_v33  ;;  %v2296_v33 = vmul.f32 %v4063_v58, %v4027_v53 }
 0x187   :  { %v3232_v10 = vadd.f32 %v3231_v34, %v3129_v36  ;;  %2331 = vadd.xlane.f32.xlu1 %v2292_v41  ;;  %2329 = vadd.xlane.f32.xlu0 %v2291_v26 }
 0x188   :  { %v3132_v61 = vpop.f32.mrb[18].mxu0  ;;  %2590 = vst [vmem:[#allocation2 + $0x38] sm:$0xff] %v2542_v28   ;;  %v3234_v2 = vadd.f32 %v3233_v54, %v1888_v5  ;;  %v2964_v18 = vpop.f32.mrb[18].mxu1  ;;  %v2295_v28 = vmul.f32 %v4065_v49, %v4027_v53 }
 0x189   :  { %v1900_v63 = vpop.f32.mrb[19].mxu0  ;;  %v3235_v20 = vadd.f32 %v2964_v18, %v4020_v47  ;;  %v1032_v52 = vpop.f32.mrb[19].mxu1  ;;  %v4101_v16 = vmul.f32 %v3232_v10, %v4032_v19  ;;  %v4104_v24 = vmul.f32 %v3232_v10, %v4027_v53 }
 0x18a   :  { %v2547_v25 = vpack.c.bf16 %v3232_v10, %v3234_v2  ;;  %v3237_v27 = vadd.f32 %v4020_v47, %v1032_v52  ;;  %v4108_v29 = vmul.f32 %v3234_v2, %v4032_v19  ;;  %v4111_v39 = vmul.f32 %v3234_v2, %v4027_v53 }
 0x18b   :  { %v3236_v48 = vadd.f32 %v3235_v20, %v3132_v61  ;;  %2199 = vadd.xlane.f32.xlu1 %v2158_v14  ;;  %2197 = vadd.xlane.f32.xlu0 %v2157_v15  ;;  %v2162_v15 = vmul.f32 %v4073_v40, %v4032_v19 }
 0x18c   :  { %v3135_v62 = vpop.f32.mrb[20].mxu0  ;;  %2591 = vst [vmem:[#allocation2 + $0x40] sm:$0xff] %v2547_v25   ;;  %v3238_v11 = vadd.f32 %v3237_v27, %v1900_v63  ;;  %v2967_v31 = vpop.f32.mrb[20].mxu1 }
 0x18d   :  { %v1912_v37 = vpop.f32.mrb[21].mxu0  ;;  %v3239_v3 = vadd.f32 %v2967_v31, %v4020_v47  ;;  %v1046_v13 = vpop.f32.mrb[21].mxu1  ;;  %v4119_v45 = vmul.f32 %v3236_v48, %v4032_v19  ;;  %v4122_v57 = vmul.f32 %v3236_v48, %v4027_v53 }
 0x18e   :  { %v2552_v43 = vpack.c.bf16 %v3236_v48, %v3238_v11  ;;  %v3241_v6 = vadd.f32 %v4020_v47, %v1046_v13  ;;  %v4126_v46 = vmul.f32 %v3238_v11, %v4032_v19  ;;  %v4129_v7 = vmul.f32 %v3238_v11, %v4027_v53 }
 0x18f   :  { %v3240_v51 = vadd.f32 %v3239_v3, %v3135_v62  ;;  %2335 = vadd.xlane.f32.xlu1 %v2294_v50  ;;  %2333 = vadd.xlane.f32.xlu0 %v2293_v44  ;;  %v2161_v48 = vmul.f32 %v4075_v42, %v4032_v19 }
 0x190   :  { %v3138_v55 = vpop.f32.mrb[22].mxu0  ;;  %2592 = vst [vmem:[#allocation2 + $0x48] sm:$0xff] %v2552_v43   ;;  %v3242_v23 = vadd.f32 %v3241_v6, %v1912_v37  ;;  %v2970_v0 = vpop.f32.mrb[22].mxu1 }
 0x191   :  { %v1924_v60 = vpop.f32.mrb[23].mxu0  ;;  %v3243_v30 = vadd.f32 %v2970_v0, %v4020_v47  ;;  %v1060_v59 = vpop.f32.mrb[23].mxu1  ;;  %v4137_v1 = vmul.f32 %v3240_v51, %v4032_v19  ;;  %v4140_v56 = vmul.f32 %v3240_v51, %v4027_v53 }
 0x192   :  { %v2557_v12 = vpack.c.bf16 %v3240_v51, %v3242_v23  ;;  %v3245_v38 = vadd.f32 %v4020_v47, %v1060_v59  ;;  %v4144_v17 = vmul.f32 %v3242_v23, %v4032_v19  ;;  %v4147_v21 = vmul.f32 %v3242_v23, %v4027_v53 }
 0x193   :  { %v3244_v35 = vadd.f32 %v3243_v30, %v3138_v55  ;;  %2203 = vadd.xlane.f32.xlu1 %v2160_v32  ;;  %2201 = vadd.xlane.f32.xlu0 %v2159_v4  ;;  %v2298_v55 = vmul.f32 %v4073_v40, %v4027_v53 }
 0x194   :  { %v3141_v36 = vpop.f32.mrb[24].mxu0  ;;  %2593 = vst [vmem:[#allocation2 + $0x50] sm:$0xff] %v2557_v12   ;;  %v3246_v9 = vadd.f32 %v3245_v38, %v1924_v60  ;;  %v2973_v5 = vpop.f32.mrb[24].mxu1  ;;  %v2297_v60 = vmul.f32 %v4075_v42, %v4027_v53  ;;  %v2164_v42 = vmul.f32 %v4084_v22, %v4032_v19 }
 0x195   :  { %v1936_v34 = vpop.f32.mrb[25].mxu0  ;;  %v3247_v41 = vadd.f32 %v2973_v5, %v4020_v47  ;;  %v1074_v26 = vpop.f32.mrb[25].mxu1  ;;  %v4155_v54 = vmul.f32 %v3244_v35, %v4032_v19  ;;  %v4158_v10 = vmul.f32 %v3244_v35, %v4027_v53 }
 0x196   :  { %v2562_v61 = vpack.c.bf16 %v3244_v35, %v3246_v9  ;;  %v3249_v2 = vadd.f32 %v4020_v47, %v1074_v26  ;;  %v4162_v18 = vmul.f32 %v3246_v9, %v4032_v19  ;;  %v4165_v58 = vmul.f32 %v3246_v9, %v4027_v53 }
 0x197   :  { %v3248_v63 = vadd.f32 %v3247_v41, %v3141_v36  ;;  %2339 = vadd.xlane.f32.xlu1 %v2296_v33  ;;  %2337 = vadd.xlane.f32.xlu0 %v2295_v28  ;;  %v2163_v41 = vmul.f32 %v4086_v8, %v4032_v19 }
 0x198   :  { %v3144_v14 = vpop.f32.mrb[26].mxu0  ;;  %2594 = vst [vmem:[#allocation2 + $0x58] sm:$0xff] %v2562_v61   ;;  %v3250_v49 = vadd.f32 %v3249_v2, %v1936_v34  ;;  %v2976_v20 = vpop.f32.mrb[26].mxu1 }
 0x199   :  { %v1948_v52 = vpop.f32.mrb[27].mxu0  ;;  %v3251_v25 = vadd.f32 %v2976_v20, %v4020_v47  ;;  %v1088_v27 = vpop.f32.mrb[27].mxu1  ;;  %v4173_v62 = vmul.f32 %v3248_v63, %v4032_v19  ;;  %v4176_v11 = vmul.f32 %v3248_v63, %v4027_v53 }
 0x19a   :  { %v2567_v31 = vpack.c.bf16 %v3248_v63, %v3250_v49  ;;  %v3253_v37 = vadd.f32 %v4020_v47, %v1088_v27  ;;  %v4180_v50 = vmul.f32 %v3250_v49, %v4032_v19  ;;  %v4183_v3 = vmul.f32 %v3250_v49, %v4027_v53 }
 0x19b   :  { %v3252_v13 = vadd.f32 %v3251_v25, %v3144_v14  ;;  %2207 = vadd.xlane.f32.xlu1 %v2162_v15  ;;  %2205 = vadd.xlane.f32.xlu0 %v2161_v48  ;;  %v2299_v15 = vmul.f32 %v4086_v8, %v4027_v53 }
 0x19c   :  { %v3147_v44 = vpop.f32.mrb[28].mxu0  ;;  %2595 = vst [vmem:[#allocation2 + $0x60] sm:$0xff] %v2567_v31   ;;  %v3254_v43 = vadd.f32 %v3253_v37, %v1948_v52  ;;  %v2979_v6 = vpop.f32.mrb[28].mxu1  ;;  %v2300_v52 = vmul.f32 %v4084_v22, %v4027_v53 }
 0x19d   :  { %v1960_v51 = vpop.f32.mrb[29].mxu0  ;;  %v3255_v23 = vadd.f32 %v2979_v6, %v4020_v47  ;;  %v1102_v0 = vpop.f32.mrb[29].mxu1  ;;  %v2176_v32 = vmul.f32 %v3252_v13, %v4032_v19  ;;  %v2312_v30 = vmul.f32 %v3252_v13, %v4027_v53 }
 0x19e   :  { %v2572_v59 = vpack.c.bf16 %v3252_v13, %v3254_v43  ;;  %v3257_v4 = vadd.f32 %v4020_v47, %v1102_v0  ;;  %v2175_v12 = vmul.f32 %v3254_v43, %v4032_v19  ;;  %v2311_v38 = vmul.f32 %v3254_v43, %v4027_v53 }
 0x19f   :  { %v3256_v35 = vadd.f32 %v3255_v23, %v3147_v44  ;;  %2343 = vadd.xlane.f32.xlu1 %v2298_v55  ;;  %2341 = vadd.xlane.f32.xlu0 %v2297_v60 }
 0x1a0   :  { %v3150_v40 = vpop.f32.mrb[30].mxu0  ;;  %2596 = vst [vmem:[#allocation2 + $0x68] sm:$0xff] %v2572_v59   ;;  %v3258_v36 = vadd.f32 %v3257_v4, %v1960_v51  ;;  %v2982_v9 = vpop.f32.mrb[30].mxu1 }
 0x1a1   :  { %v1972_v5 = vpop.f32.mrb[31].mxu0  ;;  %v3259_v34 = vadd.f32 %v2982_v9, %v4020_v47  ;;  %v1116_v33 = vpop.f32.mrb[31].mxu1  ;;  %v2178_v26 = vmul.f32 %v3256_v35, %v4032_v19  ;;  %v2314_v28 = vmul.f32 %v3256_v35, %v4027_v53 }
 0x1a2   :  { %v2577_v61 = vpack.c.bf16 %v3256_v35, %v3258_v36  ;;  %v3261_v2 = vadd.f32 %v4020_v47, %v1116_v33  ;;  %v2177_v63 = vmul.f32 %v3258_v36, %v4032_v19  ;;  %v2313_v14 = vmul.f32 %v3258_v36, %v4027_v53 }
 0x1a3   :  { %v3260_v49 = vadd.f32 %v3259_v34, %v3150_v40  ;;  %2211 = vadd.xlane.f32.xlu1 %v2164_v42  ;;  %2209 = vadd.xlane.f32.xlu0 %v2163_v41 }
 0x1a4   :  { %2597 = vst [vmem:[#allocation2 + $0x70] sm:$0xff] %v2577_v61   ;;  %v3262_v20 = vadd.f32 %v3261_v2, %v1972_v5 }
 0x1a5   :  { %v2180_v25 = vmul.f32 %v3260_v49, %v4032_v19  ;;  %v2316_v27 = vmul.f32 %v3260_v49, %v4027_v53 }
 0x1a6   :  { %v2582_v47 = vpack.c.bf16 %v3260_v49, %v3262_v20  ;;  %v2179_v48 = vmul.f32 %v3262_v20, %v4032_v19  ;;  %v2315_v31 = vmul.f32 %v3262_v20, %v4027_v53 }
 0x1a7   :  { %2347 = vadd.xlane.f32.xlu1 %v2300_v52  ;;  %2345 = vadd.xlane.f32.xlu0 %v2299_v15 }
 0x1a8   :  { %2598 = vst [vmem:[#allocation2 + $0x78] sm:$0xff] %v2582_v47  }
 0x1ab   :  { %2215 = vadd.xlane.f32.xlu1 %v4101_v16  ;;  %2213 = vadd.xlane.f32.xlu0 %v4108_v29 }
 0x1af   :  { %2351 = vadd.xlane.f32.xlu1 %v4104_v24  ;;  %2349 = vadd.xlane.f32.xlu0 %v4111_v39 }
 0x1b3   :  { %2219 = vadd.xlane.f32.xlu1 %v4119_v45  ;;  %2217 = vadd.xlane.f32.xlu0 %v4126_v46 }
 0x1b7   :  { %2355 = vadd.xlane.f32.xlu1 %v4122_v57  ;;  %2353 = vadd.xlane.f32.xlu0 %v4129_v7 }
 0x1bb   :  { %2223 = vadd.xlane.f32.xlu1 %v4137_v1  ;;  %2221 = vadd.xlane.f32.xlu0 %v4144_v17 }
 0x1bf   :  { %2359 = vadd.xlane.f32.xlu1 %v4140_v56  ;;  %2357 = vadd.xlane.f32.xlu0 %v4147_v21 }
 0x1c3   :  { %2227 = vadd.xlane.f32.xlu1 %v4155_v54  ;;  %2225 = vadd.xlane.f32.xlu0 %v4162_v18 }
 0x1c7   :  { %2363 = vadd.xlane.f32.xlu1 %v4158_v10  ;;  %2361 = vadd.xlane.f32.xlu0 %v4165_v58 }
 0x1cb   :  { %2231 = vadd.xlane.f32.xlu1 %v4173_v62  ;;  %2229 = vadd.xlane.f32.xlu0 %v4180_v50 }
 0x1cf   :  { %2367 = vadd.xlane.f32.xlu1 %v4176_v11  ;;  %2365 = vadd.xlane.f32.xlu0 %v4183_v3 }
 0x1d3   :  { %2235 = vadd.xlane.f32.xlu1 %v2176_v32  ;;  %2233 = vadd.xlane.f32.xlu0 %v2175_v12 }
 0x1d7   :  { %2371 = vadd.xlane.f32.xlu1 %v2312_v30  ;;  %2369 = vadd.xlane.f32.xlu0 %v2311_v38 }
 0x1db   :  { %2239 = vadd.xlane.f32.xlu1 %v2178_v26  ;;  %2237 = vadd.xlane.f32.xlu0 %v2177_v63 }
 0x1df   :  { %2375 = vadd.xlane.f32.xlu1 %v2314_v28  ;;  %2373 = vadd.xlane.f32.xlu0 %v2313_v14 }
 0x1e3   :  { %2243 = vadd.xlane.f32.xlu1 %v2180_v25  ;;  %2241 = vadd.xlane.f32.xlu0 %v2179_v48 }
 0x1e7   :  { %2379 = vadd.xlane.f32.xlu1 %v2316_v27  ;;  %2377 = vadd.xlane.f32.xlu0 %v2315_v31 }
 0x1e8   :  { %3405 = shalt.err (!%p3402_p4)
}
 0x1e9   :  { %s3406_s8 = scalar_lea.hbm %s4506_s5, 2048 }
 0x1ea   :  { %p3407_p5 = scmp.ne.s32.totalorder %s4506_s5, %s3406_s8  ;;  %p3410_p6 = scmp.lt.u32.totalorder %s3406_s8, %s4506_s5 }
 0x1ec   :  { %p3412_p7 = pnand %p3410_p6, %p3407_p5 }
 0x1ee   :  { %3415 = shalt.err (!%p3412_p7)
}
 0x1ef   :  { %s3419_s13 = smov 64   ;;  %s3420_s14 = smov 4  }
 0x1f0   :  { %2424 = dma.vmem_to_hbm [thread:$0]  %s2419_s3, 2048, %s4506_s5, [#allocation3], %s3419_s13, %s3419_s13, %s3420_s14  }
 0x1f8   :  { %v2320_v53 = vpop.xlane.xlu1 %2319  ;;  %v2184_v19 = vpop.xlane.xlu0 %2183 }
 0x1f9   :  { %2382 = vst.msk [vmem:[%s4508_s7 + $0x8] sm:$0xff] %vm2245_vm1, %v2320_v53  ;;  %2247 = vst.msk [vmem:[%s4507_s6 + $0x8] sm:$0xff] %vm2245_vm1, %v2184_v19 }
 0x1fc   :  { %v2182_v22 = vpop.xlane.xlu0 %2181  ;;  %v2188_v8 = vpop.xlane.xlu1 %2187 }
 0x1fd   :  { %2246 = vst.msk [vmem:[%s4507_s6] sm:$0xff] %vm2245_vm1, %v2182_v22  ;;  %2249 = vst.msk [vmem:[%s4507_s6 + $0x18] sm:$0xff] %vm2245_vm1, %v2188_v8 }
 0x200   :  { %v2318_v16 = vpop.xlane.xlu0 %2317  ;;  %v2324_v24 = vpop.xlane.xlu1 %2323 }
 0x201   :  { %2381 = vst.msk [vmem:[%s4508_s7] sm:$0xff] %vm2245_vm1, %v2318_v16  ;;  %2384 = vst.msk [vmem:[%s4508_s7 + $0x18] sm:$0xff] %vm2245_vm1, %v2324_v24 }
 0x204   :  { %v2322_v29 = vpop.xlane.xlu0 %2321  ;;  %v2186_v39 = vpop.xlane.xlu1 %2185 }
 0x205   :  { %2383 = vst.msk [vmem:[%s4508_s7 + $0x10] sm:$0xff] %vm2245_vm1, %v2322_v29  ;;  %2248 = vst.msk [vmem:[%s4507_s6 + $0x10] sm:$0xff] %vm2245_vm1, %v2186_v39 }
 0x208   :  { %v2192_v45 = vpop.xlane.xlu1 %2191  ;;  %v2190_v57 = vpop.xlane.xlu0 %2189 }
 0x209   :  { %2251 = vst.msk [vmem:[%s4507_s6 + $0x28] sm:$0xff] %vm2245_vm1, %v2192_v45  ;;  %2250 = vst.msk [vmem:[%s4507_s6 + $0x20] sm:$0xff] %vm2245_vm1, %v2190_v57 }
 0x20c   :  { %v2328_v46 = vpop.xlane.xlu1 %2327  ;;  %v2326_v7 = vpop.xlane.xlu0 %2325 }
 0x20d   :  { %2386 = vst.msk [vmem:[%s4508_s7 + $0x28] sm:$0xff] %vm2245_vm1, %v2328_v46  ;;  %2385 = vst.msk [vmem:[%s4508_s7 + $0x20] sm:$0xff] %vm2245_vm1, %v2326_v7 }
 0x210   :  { %v2196_v1 = vpop.xlane.xlu1 %2195  ;;  %v2194_v56 = vpop.xlane.xlu0 %2193 }
 0x211   :  { %2253 = vst.msk [vmem:[%s4507_s6 + $0x38] sm:$0xff] %vm2245_vm1, %v2196_v1  ;;  %2252 = vst.msk [vmem:[%s4507_s6 + $0x30] sm:$0xff] %vm2245_vm1, %v2194_v56 }
 0x214   :  { %v2332_v17 = vpop.xlane.xlu1 %2331  ;;  %v2330_v21 = vpop.xlane.xlu0 %2329 }
 0x215   :  { %2388 = vst.msk [vmem:[%s4508_s7 + $0x38] sm:$0xff] %vm2245_vm1, %v2332_v17  ;;  %2387 = vst.msk [vmem:[%s4508_s7 + $0x30] sm:$0xff] %vm2245_vm1, %v2330_v21 }
 0x218   :  { %v2200_v54 = vpop.xlane.xlu1 %2199  ;;  %v2198_v10 = vpop.xlane.xlu0 %2197 }
 0x219   :  { %2255 = vst.msk [vmem:[%s4507_s6 + $0x48] sm:$0xff] %vm2245_vm1, %v2200_v54  ;;  %2254 = vst.msk [vmem:[%s4507_s6 + $0x40] sm:$0xff] %vm2245_vm1, %v2198_v10 }
 0x21c   :  { %v2336_v18 = vpop.xlane.xlu1 %2335  ;;  %v2334_v58 = vpop.xlane.xlu0 %2333 }
 0x21d   :  { %2390 = vst.msk [vmem:[%s4508_s7 + $0x48] sm:$0xff] %vm2245_vm1, %v2336_v18  ;;  %2389 = vst.msk [vmem:[%s4508_s7 + $0x40] sm:$0xff] %vm2245_vm1, %v2334_v58 }
 0x220   :  { %v2204_v62 = vpop.xlane.xlu1 %2203  ;;  %v2202_v11 = vpop.xlane.xlu0 %2201 }
 0x221   :  { %2257 = vst.msk [vmem:[%s4507_s6 + $0x58] sm:$0xff] %vm2245_vm1, %v2204_v62  ;;  %2256 = vst.msk [vmem:[%s4507_s6 + $0x50] sm:$0xff] %vm2245_vm1, %v2202_v11 }
 0x224   :  { %v2340_v37 = vpop.xlane.xlu1 %2339  ;;  %v2338_v50 = vpop.xlane.xlu0 %2337 }
 0x225   :  { %2392 = vst.msk [vmem:[%s4508_s7 + $0x58] sm:$0xff] %vm2245_vm1, %v2340_v37  ;;  %2391 = vst.msk [vmem:[%s4508_s7 + $0x50] sm:$0xff] %vm2245_vm1, %v2338_v50 }
 0x228   :  { %v2208_v3 = vpop.xlane.xlu1 %2207  ;;  %v2206_v13 = vpop.xlane.xlu0 %2205 }
 0x229   :  { %2259 = vst.msk [vmem:[%s4507_s6 + $0x68] sm:$0xff] %vm2245_vm1, %v2208_v3  ;;  %2258 = vst.msk [vmem:[%s4507_s6 + $0x60] sm:$0xff] %vm2245_vm1, %v2206_v13 }
 0x22c   :  { %v2344_v44 = vpop.xlane.xlu1 %2343  ;;  %v2342_v43 = vpop.xlane.xlu0 %2341 }
 0x22d   :  { %2394 = vst.msk [vmem:[%s4508_s7 + $0x68] sm:$0xff] %vm2245_vm1, %v2344_v44  ;;  %2393 = vst.msk [vmem:[%s4508_s7 + $0x60] sm:$0xff] %vm2245_vm1, %v2342_v43 }
 0x230   :  { %v2212_v6 = vpop.xlane.xlu1 %2211  ;;  %v2210_v51 = vpop.xlane.xlu0 %2209 }
 0x231   :  { %2261 = vst.msk [vmem:[%s4507_s6 + $0x78] sm:$0xff] %vm2245_vm1, %v2212_v6  ;;  %2260 = vst.msk [vmem:[%s4507_s6 + $0x70] sm:$0xff] %vm2245_vm1, %v2210_v51 }
 0x234   :  { %v2348_v55 = vpop.xlane.xlu1 %2347  ;;  %v2346_v23 = vpop.xlane.xlu0 %2345 }
 0x235   :  { %2396 = vst.msk [vmem:[%s4508_s7 + $0x78] sm:$0xff] %vm2245_vm1, %v2348_v55  ;;  %2395 = vst.msk [vmem:[%s4508_s7 + $0x70] sm:$0xff] %vm2245_vm1, %v2346_v23 }
 0x238   :  { %v2216_v0 = vpop.xlane.xlu1 %2215  ;;  %v2214_v60 = vpop.xlane.xlu0 %2213 }
 0x239   :  { %2263 = vst.msk [vmem:[%s4507_s6 + $0x88] sm:$0xff] %vm2245_vm1, %v2216_v0  ;;  %2262 = vst.msk [vmem:[%s4507_s6 + $0x80] sm:$0xff] %vm2245_vm1, %v2214_v60 }
 0x23c   :  { %v2352_v32 = vpop.xlane.xlu1 %2351  ;;  %v2350_v30 = vpop.xlane.xlu0 %2349 }
 0x23d   :  { %2398 = vst.msk [vmem:[%s4508_s7 + $0x88] sm:$0xff] %vm2245_vm1, %v2352_v32  ;;  %2397 = vst.msk [vmem:[%s4508_s7 + $0x80] sm:$0xff] %vm2245_vm1, %v2350_v30 }
 0x240   :  { %v2220_v59 = vpop.xlane.xlu1 %2219  ;;  %v2218_v4 = vpop.xlane.xlu0 %2217 }
 0x241   :  { %2265 = vst.msk [vmem:[%s4507_s6 + $0x98] sm:$0xff] %vm2245_vm1, %v2220_v59  ;;  %2264 = vst.msk [vmem:[%s4507_s6 + $0x90] sm:$0xff] %vm2245_vm1, %v2218_v4 }
 0x244   :  { %v2356_v12 = vpop.xlane.xlu1 %2355  ;;  %v2354_v38 = vpop.xlane.xlu0 %2353 }
 0x245   :  { %2400 = vst.msk [vmem:[%s4508_s7 + $0x98] sm:$0xff] %vm2245_vm1, %v2356_v12  ;;  %2399 = vst.msk [vmem:[%s4508_s7 + $0x90] sm:$0xff] %vm2245_vm1, %v2354_v38 }
 0x248   :  { %v2224_v35 = vpop.xlane.xlu1 %2223  ;;  %v2222_v40 = vpop.xlane.xlu0 %2221 }
 0x249   :  { %2267 = vst.msk [vmem:[%s4507_s6 + $0xa8] sm:$0xff] %vm2245_vm1, %v2224_v35  ;;  %2266 = vst.msk [vmem:[%s4507_s6 + $0xa0] sm:$0xff] %vm2245_vm1, %v2222_v40 }
 0x24c   :  { %v2360_v36 = vpop.xlane.xlu1 %2359  ;;  %v2358_v9 = vpop.xlane.xlu0 %2357 }
 0x24d   :  { %2402 = vst.msk [vmem:[%s4508_s7 + $0xa8] sm:$0xff] %vm2245_vm1, %v2360_v36  ;;  %2401 = vst.msk [vmem:[%s4508_s7 + $0xa0] sm:$0xff] %vm2245_vm1, %v2358_v9 }
 0x250   :  { %v2228_v5 = vpop.xlane.xlu1 %2227  ;;  %v2226_v42 = vpop.xlane.xlu0 %2225 }
 0x251   :  { %2269 = vst.msk [vmem:[%s4507_s6 + $0xb8] sm:$0xff] %vm2245_vm1, %v2228_v5  ;;  %2268 = vst.msk [vmem:[%s4507_s6 + $0xb0] sm:$0xff] %vm2245_vm1, %v2226_v42 }
 0x254   :  { %v2364_v34 = vpop.xlane.xlu1 %2363  ;;  %v2362_v33 = vpop.xlane.xlu0 %2361 }
 0x255   :  { %2404 = vst.msk [vmem:[%s4508_s7 + $0xb8] sm:$0xff] %vm2245_vm1, %v2364_v34  ;;  %2403 = vst.msk [vmem:[%s4508_s7 + $0xb0] sm:$0xff] %vm2245_vm1, %v2362_v33 }
 0x258   :  { %v2232_v41 = vpop.xlane.xlu1 %2231  ;;  %v2230_v26 = vpop.xlane.xlu0 %2229 }
 0x259   :  { %2271 = vst.msk [vmem:[%s4507_s6 + $0xc8] sm:$0xff] %vm2245_vm1, %v2232_v41  ;;  %2270 = vst.msk [vmem:[%s4507_s6 + $0xc0] sm:$0xff] %vm2245_vm1, %v2230_v26 }
 0x25c   :  { %v2368_v28 = vpop.xlane.xlu1 %2367  ;;  %v2366_v61 = vpop.xlane.xlu0 %2365 }
 0x25d   :  { %2406 = vst.msk [vmem:[%s4508_s7 + $0xc8] sm:$0xff] %vm2245_vm1, %v2368_v28  ;;  %2405 = vst.msk [vmem:[%s4508_s7 + $0xc0] sm:$0xff] %vm2245_vm1, %v2366_v61 }
 0x260   :  { %v2236_v2 = vpop.xlane.xlu1 %2235  ;;  %v2234_v63 = vpop.xlane.xlu0 %2233 }
 0x261   :  { %2273 = vst.msk [vmem:[%s4507_s6 + $0xd8] sm:$0xff] %vm2245_vm1, %v2236_v2  ;;  %2272 = vst.msk [vmem:[%s4507_s6 + $0xd0] sm:$0xff] %vm2245_vm1, %v2234_v63 }
 0x264   :  { %v2372_v14 = vpop.xlane.xlu1 %2371  ;;  %v2370_v49 = vpop.xlane.xlu0 %2369 }
 0x265   :  { %2408 = vst.msk [vmem:[%s4508_s7 + $0xd8] sm:$0xff] %vm2245_vm1, %v2372_v14  ;;  %2407 = vst.msk [vmem:[%s4508_s7 + $0xd0] sm:$0xff] %vm2245_vm1, %v2370_v49 }
 0x268   :  { %v2240_v20 = vpop.xlane.xlu1 %2239  ;;  %v2238_v52 = vpop.xlane.xlu0 %2237 }
 0x269   :  { %2275 = vst.msk [vmem:[%s4507_s6 + $0xe8] sm:$0xff] %vm2245_vm1, %v2240_v20  ;;  %2274 = vst.msk [vmem:[%s4507_s6 + $0xe0] sm:$0xff] %vm2245_vm1, %v2238_v52 }
 0x26c   :  { %v2376_v15 = vpop.xlane.xlu1 %2375  ;;  %v2374_v25 = vpop.xlane.xlu0 %2373 }
 0x26d   :  { %2410 = vst.msk [vmem:[%s4508_s7 + $0xe8] sm:$0xff] %vm2245_vm1, %v2376_v15  ;;  %2409 = vst.msk [vmem:[%s4508_s7 + $0xe0] sm:$0xff] %vm2245_vm1, %v2374_v25 }
 0x270   :  { %v2244_v27 = vpop.xlane.xlu1 %2243  ;;  %v2242_v47 = vpop.xlane.xlu0 %2241 }
 0x271   :  { %2277 = vst.msk [vmem:[%s4507_s6 + $0xf8] sm:$0xff] %vm2245_vm1, %v2244_v27  ;;  %2276 = vst.msk [vmem:[%s4507_s6 + $0xf0] sm:$0xff] %vm2245_vm1, %v2242_v47 }
 0x274   :  { %v2380_v48 = vpop.xlane.xlu1 %2379  ;;  %v2378_v31 = vpop.xlane.xlu0 %2377 }
 0x275   :  { %2412 = vst.msk [vmem:[%s4508_s7 + $0xf8] sm:$0xff] %vm2245_vm1, %v2380_v48  ;;  %2411 = vst.msk [vmem:[%s4508_s7 + $0xf0] sm:$0xff] %vm2245_vm1, %v2378_v31 }
 0x276   :  { %3416 = dma.done.wait [#allocation3], 2048  }
 0x277   :  { %3417 = vsyncadd [#allocation3], 4294965248 }
 0x278   :  { %2436 = vsyncpa [#allocation3], 1 }

</bundles_post_ra>
